<compile_context>
chip_gen: v6e
topology: v6e:2x2x1
jax: 0.10.0
libtpu: 0.0.40
codegen_flags: <defaults>
</compile_context>

<pallas_src>
import functools
import math

import jax
import jax.numpy as jnp
from jax.experimental import pallas as pl
from jax.experimental.pallas import tpu as pltpu


# ----------------------------------------------------------------------------
# Fused encoder kernel: attention -> BiGRU -> MLP  (num_heads = 1)
# ----------------------------------------------------------------------------
def _enc_fused_kernel(x_ref, kt_ref, q_ref, blk_ref,
                      wq_ref, bq_ref, wkt_ref, bkt_ref, wo_ref, bo_ref,
                      wih_ref, bih_ref, whh_ref, bhh_ref,
                      w1_ref, b1_ref, w2_ref, b2_ref,
                      o_ref, *, BN, Lq, T):
    f32 = jnp.float32
    D2 = x_ref.shape[1]          # x rows: (BN*T, 2*input_dim) = [data*mask | mask]
    D = D2 // 2
    E = wq_ref.shape[0]
    H = wih_ref.shape[0]

    # ---------------- multiTimeAttention ----------------
    # q: (R, E) time-major rows (q, b);  kT: (E, C) keys pre-transposed in the
    # wrapper so the score matmul needs no in-kernel transpose.
    q = jnp.dot(q_ref[...], wq_ref[...], preferred_element_type=f32) + bq_ref[...]
    kT = jnp.dot(wkt_ref[...], kt_ref[...], preferred_element_type=f32) + bkt_ref[...]

    blk = blk_ref[...]                                   # (R, C) 0/1 block-diag
    scores = jnp.dot(q, kT, preferred_element_type=f32)  # one flat MXU pass
    scores = scores * (1.0 / math.sqrt(E)) + (blk - 1.0) * 1e9
    # Row-max over all (in-batch) keys -- see module-level NOTE on numerics.
    w = jnp.exp(scores - jnp.max(scores, axis=1, keepdims=True))   # (R, C)

    x_val = x_ref[...]                                   # (C, 2D)
    m_half = x_val[:, D:]
    mask = jnp.concatenate([m_half, m_half], axis=-1)    # (C, 2D)
    # Fused numerator/denominator: ONE matmul against [mask*value | mask].
    vcat = jnp.concatenate([mask * x_val, mask], axis=-1)            # (C, 4D)
    nd = jnp.dot(w, vcat, preferred_element_type=f32)                # (R, 4D)
    numer, denom = nd[:, :D2], nd[:, D2:]
    # torch's masked_fill(-1e9)+softmax degrades to a uniform average over key
    # time for fully-masked feature columns: per-batch mean via one tiny matmul.
    mean_v = jnp.dot(blk * (1.0 / T), x_val, preferred_element_type=f32)
    inv_den = pl.reciprocal(jnp.maximum(denom, 1e-30), approx=True)
    att = jnp.where(denom > 0.0, numer * inv_den, mean_v)            # (R, 2D)

    gru_in = (jnp.dot(att, wo_ref[...], preferred_element_type=f32)
              + bo_ref[...])                                         # (R, H)

    # ---------------- bidirectional GRU ----------------
    # Input-to-hidden for BOTH directions in one hoisted matmul.
    # Column layout of gi_all: [r_f z_f n_f | r_b z_b n_b]  (direction-blocked).
    gi_all = (jnp.dot(gru_in, wih_ref[...], preferred_element_type=f32)
              + bih_ref[...])                                        # (R, 6H)

    whh = whh_ref[...]   # (2H, 6H)  gate-grouped columns [r_f r_b z_f z_b n_f n_b]
    bhh = bhh_ref[...]   # (1, 6H)

    # Per-step gate inputs (independent of h -> off the recurrence chain).
    # Rows are time-major, so time t lives at rows t*BN:(t+1)*BN.
    gi_rz, gi_n = [], []
    for s in range(Lq):
        tb = Lq - 1 - s
        gf = gi_all[s * BN:(s + 1) * BN, :]       # fwd gates at time s
        gb = gi_all[tb * BN:(tb + 1) * BN, :]     # bwd gates at time Lq-1-s
        gi_rz.append(jnp.concatenate(
            [gf[:, 0:H], gb[:, 3 * H:4 * H],
             gf[:, H:2 * H], gb[:, 4 * H:5 * H]], axis=-1))          # (BN, 4H)
        gi_n.append(jnp.concatenate(
            [gf[:, 2 * H:3 * H], gb[:, 5 * H:6 * H]], axis=-1))      # (BN, 2H)

    # Merged fwd/bwd recurrence: one (BN,2H)x(2H,6H) matmul, one fused sigmoid
    # over the 4H-wide r/z slab and one 2H tanh per step.
    h = jnp.zeros((BN, 2 * H), f32)
    hs_f = [None] * Lq
    hs_b = [None] * Lq
    for s in range(Lq):
        gh = jnp.dot(h, whh, preferred_element_type=f32) + bhh       # (BN, 6H)
        rz = jax.nn.sigmoid(gi_rz[s] + gh[:, 0:4 * H])
        r = rz[:, 0:2 * H]
        z = rz[:, 2 * H:4 * H]
        n = jnp.tanh(gi_n[s] + r * gh[:, 4 * H:6 * H])
        h = (1.0 - z) * n + z * h
        hs_f[s] = h[:, 0:H]                # fwd hidden for time s
        hs_b[Lq - 1 - s] = h[:, H:2 * H]   # bwd hidden for time Lq-1-s

    # Time-major (t, b) rows -- matches the output ordering; no in-kernel reshape.
    gru_out = jnp.concatenate(
        [jnp.concatenate([hs_f[t], hs_b[t]], axis=-1) for t in range(Lq)], axis=0)

    # ---------------- hiddens_to_z0: Linear -> ReLU -> Linear ----------------
    h1 = jnp.maximum(jnp.dot(gru_out, w1_ref[...], preferred_element_type=f32)
                     + b1_ref[...], 0.0)
    z0 = jnp.dot(h1, w2_ref[...], preferred_element_type=f32) + b2_ref[...]
    o_ref[...] = z0.astype(o_ref.dtype)


# ----------------------------------------------------------------------------
# Plain-JAX glue: learned time embedding (learn_emb=True path)
# ----------------------------------------------------------------------------
def time_embed(p, tt):
    # learn_time_embedding: cat([Linear(1,1)(t), sin(Linear(1,E-1)(t))], -1)
    ttx = tt[..., None]
    out1 = ttx * p["w_lin"] + p["b_lin"]            # (..., 1)
    out2 = jnp.sin(ttx * p["w_per"] + p["b_per"])   # (..., E-1)
    return jnp.concatenate([out1, out2], axis=-1)
# TODO(synk): fixed_time_embedding (learn_emb=False) is not implemented; only
# the learned-embedding path of the module is covered.


def enc_mtan_rnn_forward(params, x, time_steps, query):
    """x: (B,N,T,2*input_dim) = cat(data, mask); time_steps: (B,N,T); query: (B,N,Lr)."""
    B, N, T, D2 = x.shape
    Lr = query.shape[-1]
    E = params["att"]["wq"].shape[0]
    H = params["gru"]["whf"].shape[0]
    out_dim = params["mlp"]["w2"].shape[1]
    BN = B * N
    R, C = Lr * BN, BN * T
    f32 = jnp.float32

    # TODO(synk): the fused flat score matmul is O((BN)^2); for large BN revert
    # to a batched/grid formulation (and a VMEM-aware split, esp. on v7x).
    assert R <= 1024 and C <= 1024, "flat-score path sized for small BN*Lr / BN*T"

    key_emb = time_embed(params["emb"], time_steps)     # (B,N,T,E)
    qry_emb = time_embed(params["emb"], query)          # (B,N,Lr,E)

    # --- all flattening / transposition is wrapper-side layout plumbing ---
    x_flat = x.reshape(C, D2)
    kemb_t = key_emb.reshape(C, E).T                                      # (E, C)
    qemb_flat = jnp.transpose(qry_emb.reshape(BN, Lr, E), (1, 0, 2)).reshape(R, E)

    # Block-diagonal batch-compatibility mask: blk[q*BN+b, b'*T+t] = (b == b').
    blk = jnp.tile(jnp.repeat(jnp.eye(BN, dtype=f32), T, axis=1), (Lr, 1))

    a, g, m = params["att"], params["gru"], params["mlp"]

    # --- merged GRU weights, built once outside the kernel ---
    # input->hidden: direction-blocked columns [r_f z_f n_f | r_b z_b n_b]
    wih = jnp.concatenate([g["wif"], g["wib"]], axis=1)                   # (H, 6H)
    bih = jnp.concatenate([g["bif"], g["bib"]], axis=1)                   # (1, 6H)
    # hidden->hidden: block-diagonal, gate-grouped columns [r_f r_b z_f z_b n_f n_b]
    whf, whb, bhf, bhb = g["whf"], g["whb"], g["bhf"], g["bhb"]
    Z = jnp.zeros((H, H), f32)
    whh = jnp.concatenate([
        jnp.concatenate([whf[:, 0:H], Z, whf[:, H:2 * H], Z, whf[:, 2 * H:3 * H], Z], axis=1),
        jnp.concatenate([Z, whb[:, 0:H], Z, whb[:, H:2 * H], Z, whb[:, 2 * H:3 * H]], axis=1),
    ], axis=0)                                                            # (2H, 6H)
    bhh = jnp.concatenate([bhf[:, 0:H], bhb[:, 0:H], bhf[:, H:2 * H], bhb[:, H:2 * H],
                           bhf[:, 2 * H:3 * H], bhb[:, 2 * H:3 * H]], axis=1)  # (1, 6H)

    wk_t = a["wk"].T                                                      # (E, E)
    bk_t = a["bk"].T                                                      # (E, 1)

    inputs = (x_flat, kemb_t, qemb_flat, blk,
              a["wq"], a["bq"], wk_t, bk_t, a["wo"], a["bo"],
              wih, bih, whh, bhh,
              m["w1"], m["b1"], m["w2"], m["b2"])

    def fullspec(arr):   # full-array block, fetched once
        return pl.BlockSpec(arr.shape, lambda i: (0,) * arr.ndim)

    kernel = functools.partial(_enc_fused_kernel, BN=BN, Lq=Lr, T=T)

    out = pl.pallas_call(
        kernel,
        out_shape=jax.ShapeDtypeStruct((R, out_dim), x.dtype),
        grid=(1,),  # latency-bound kernel; single step (v5e/v6e have one TC).
        # TODO(synk): on v7x (2 TensorCores) a verified core-parallel 2-way
        # batch split (pltpu.CORE_PARALLEL / pl.core_map) could help at larger BN.
        in_specs=[fullspec(arr) for arr in inputs],
        out_specs=pl.BlockSpec((R, out_dim), lambda i: (0, 0)),
        compiler_params=pltpu.CompilerParams(dimension_semantics=("arbitrary",)),
    )(*inputs)

    # Undo the time-major row ordering outside the kernel.
    return out.reshape(Lr, B, N, out_dim).transpose(1, 2, 0, 3)


# ----------------------------------------------------------------------------
# Pure-JAX f32 reference (direct transcription of the PyTorch module)
# ----------------------------------------------------------------------------
def enc_mtan_rnn_reference(params, x, time_steps, query):
    B, N, T, D2 = x.shape
    D = D2 // 2
    E = params["att"]["wq"].shape[0]
    H = params["gru"]["whf"].shape[0]
    a, g, m = params["att"], params["gru"], params["mlp"]

    key = time_embed(params["emb"], time_steps)
    qry = time_embed(params["emb"], query)
    q = qry @ a["wq"] + a["bq"][0]
    k = key @ a["wk"] + a["bk"][0]
    scores = jnp.einsum('bnqe,bnke->bnqk', q, k) / math.sqrt(E)
    mask = jnp.concatenate([x[..., D:], x[..., D:]], axis=-1)      # (B,N,T,2D)
    s3 = jnp.broadcast_to(scores[..., None], scores.shape + (D2,)) # (B,N,Lq,T,2D)
    s3 = jnp.where(mask[:, :, None, :, :] == 0.0, -1e9, s3)
    p = jax.nn.softmax(s3, axis=-2)
    att = jnp.sum(p * x[:, :, None, :, :], axis=-2)                # (B,N,Lq,2D)
    gru_in = (att @ a["wo"] + a["bo"][0]).reshape(B * N, -1, H)

    def run(w_ih, w_hh, b_ih, b_hh, xs, reverse):
        L = xs.shape[1]
        h = jnp.zeros((xs.shape[0], H), jnp.float32)
        outs = [None] * L
        order = range(L - 1, -1, -1) if reverse else range(L)
        for t in order:
            gi = xs[:, t] @ w_ih + b_ih[0]
            gh = h @ w_hh + b_hh[0]
            r = jax.nn.sigmoid(gi[:, :H] + gh[:, :H])
            zg = jax.nn.sigmoid(gi[:, H:2 * H] + gh[:, H:2 * H])
            n = jnp.tanh(gi[:, 2 * H:] + r * gh[:, 2 * H:])
            h = (1.0 - zg) * n + zg * h
            outs[t] = h
        return jnp.stack(outs, axis=1)

    hf = run(g["wif"], g["whf"], g["bif"], g["bhf"], gru_in, False)
    hb = run(g["wib"], g["whb"], g["bib"], g["bhb"], gru_in, True)
    go = jnp.concatenate([hf, hb], axis=-1)
    h1 = jax.nn.relu(go @ m["w1"] + m["b1"][0])
    z = h1 @ m["w2"] + m["b2"][0]
    return z.reshape(B, N, -1, m["w2"].shape[1])


# ----------------------------------------------------------------------------
# Deterministic parameter initialization (PyTorch-default-style uniform)
# ----------------------------------------------------------------------------
def _uniform(key, shape, bound):
    return jax.random.uniform(key, shape, jnp.float32, -bound, bound)


def _init_linear(key, fan_in, fan_out):
    kw, kb = jax.random.split(key)
    b = 1.0 / math.sqrt(fan_in)
    return _uniform(kw, (fan_in, fan_out), b), _uniform(kb, (1, fan_out), b)


def init_params(key, input_dim, latent_dim=2, nhidden=16, embed_time=16):
    ks = jax.random.split(key, 17)
    b_gru = 1.0 / math.sqrt(nhidden)
    wq, bq = _init_linear(ks[0], embed_time, embed_time)
    wk, bk = _init_linear(ks[1], embed_time, embed_time)
    wo, bo = _init_linear(ks[2], 2 * input_dim, nhidden)
    w1, b1 = _init_linear(ks[3], 2 * nhidden, 50)
    w2, b2 = _init_linear(ks[4], 50, 2 * latent_dim)
    return {
        "emb": {
            "w_lin": _uniform(ks[5], (1,), 1.0), "b_lin": _uniform(ks[6], (1,), 1.0),
            "w_per": _uniform(ks[7], (embed_time - 1,), 1.0),
            "b_per": _uniform(ks[8], (embed_time - 1,), 1.0),
        },
        # num_heads = 1 assumed (module default).
        "att": {"wq": wq, "bq": bq, "wk": wk, "bk": bk, "wo": wo, "bo": bo},
        "gru": {
            "wif": _uniform(ks[9], (nhidden, 3 * nhidden), b_gru),
            "whf": _uniform(ks[10], (nhidden, 3 * nhidden), b_gru),
            "bif": _uniform(ks[11], (1, 3 * nhidden), b_gru),
            "bhf": _uniform(ks[12], (1, 3 * nhidden), b_gru),
            "wib": _uniform(ks[13], (nhidden, 3 * nhidden), b_gru),
            "whb": _uniform(ks[14], (nhidden, 3 * nhidden), b_gru),
            "bib": _uniform(ks[15], (1, 3 * nhidden), b_gru),
            "bhb": _uniform(ks[16], (1, 3 * nhidden), b_gru),
        },
        "mlp": {"w1": w1, "b1": b1, "w2": w2, "b2": b2},
    }


# ----------------------------------------------------------------------------
if __name__ == "__main__":
    input_dim, latent_dim = 4, 2
    nhidden = 16
    embed_time = 16
    B, N, T, Lr = 2, 3, 8, 6

    master = jax.random.PRNGKey(0)
    kp, kx, km, kt, kq = jax.random.split(master, 5)

    params = init_params(kp, input_dim, latent_dim, nhidden, embed_time)

    data = jax.random.normal(kx, (B, N, T, input_dim), jnp.float32)
    obs_mask = (jax.random.uniform(km, (B, N, T, input_dim)) > 0.3).astype(jnp.float32)
    x = jnp.concatenate([data * obs_mask, obs_mask], axis=-1)      # (B,N,T,2D)
    time_steps = jnp.sort(jax.random.uniform(kt, (B, N, T)), axis=-1)
    query = jnp.sort(jax.random.uniform(kq, (B, N, Lr)), axis=-1)

    fwd = jax.jit(enc_mtan_rnn_forward)
    out = fwd(params, x, time_steps, query)
    jax.block_until_ready(out)

    ref = enc_mtan_rnn_reference(params, x, time_steps, query)
    maxdiff = float(jnp.max(jnp.abs(out - ref)))

    assert out.shape == (B, N, Lr, 2 * latent_dim)
    assert bool(jnp.all(jnp.isfinite(out)))
    # f32 everywhere; only the attention normalization uses approx reciprocal.
    assert maxdiff < 1e-2, f"kernel/reference mismatch: {maxdiff}"
    print("KERNEL_OK")
</pallas_src>

<mosaic_0001>
module attributes {stable_mosaic.version = 11 : i64} {
  func.func @_enc_fused_kernel(%arg0: i32, %arg1: memref<48x8xf32, #tpu.memory_space<vmem>>, %arg2: memref<16x48xf32, #tpu.memory_space<vmem>>, %arg3: memref<36x16xf32, #tpu.memory_space<vmem>>, %arg4: memref<36x48xf32, #tpu.memory_space<vmem>>, %arg5: memref<16x16xf32, #tpu.memory_space<vmem>>, %arg6: memref<1x16xf32, #tpu.memory_space<vmem>>, %arg7: memref<16x16xf32, #tpu.memory_space<vmem>>, %arg8: memref<16x1xf32, #tpu.memory_space<vmem>>, %arg9: memref<8x16xf32, #tpu.memory_space<vmem>>, %arg10: memref<1x16xf32, #tpu.memory_space<vmem>>, %arg11: memref<16x96xf32, #tpu.memory_space<vmem>>, %arg12: memref<1x96xf32, #tpu.memory_space<vmem>>, %arg13: memref<32x96xf32, #tpu.memory_space<vmem>>, %arg14: memref<1x96xf32, #tpu.memory_space<vmem>>, %arg15: memref<32x50xf32, #tpu.memory_space<vmem>>, %arg16: memref<1x50xf32, #tpu.memory_space<vmem>>, %arg17: memref<50x4xf32, #tpu.memory_space<vmem>>, %arg18: memref<1x4xf32, #tpu.memory_space<vmem>>, %arg19: memref<36x4xf32, #tpu.memory_space<vmem>>) attributes {dimension_semantics = [#tpu.dimension_semantics<arbitrary>], iteration_bounds = array<i64: 1>, scalar_prefetch = 0 : i64, scratch_operands = 0 : i64, tpu.core_type = #tpu.core_type<tc>, window_params = [{pipeline_mode = #tpu.pipeline_mode<synchronous>, transform_indices = @transform_0, window_bounds = array<i64: 48, 8>}, {pipeline_mode = #tpu.pipeline_mode<synchronous>, transform_indices = @transform_1, window_bounds = array<i64: 16, 48>}, {pipeline_mode = #tpu.pipeline_mode<synchronous>, transform_indices = @transform_2, window_bounds = array<i64: 36, 16>}, {pipeline_mode = #tpu.pipeline_mode<synchronous>, transform_indices = @transform_3, window_bounds = array<i64: 36, 48>}, {pipeline_mode = #tpu.pipeline_mode<synchronous>, transform_indices = @transform_4, window_bounds = array<i64: 16, 16>}, {pipeline_mode = #tpu.pipeline_mode<synchronous>, transform_indices = @transform_5, window_bounds = array<i64: 1, 16>}, {pipeline_mode = #tpu.pipeline_mode<synchronous>, transform_indices = @transform_6, window_bounds = array<i64: 16, 16>}, {pipeline_mode = #tpu.pipeline_mode<synchronous>, transform_indices = @transform_7, window_bounds = array<i64: 16, 1>}, {pipeline_mode = #tpu.pipeline_mode<synchronous>, transform_indices = @transform_8, window_bounds = array<i64: 8, 16>}, {pipeline_mode = #tpu.pipeline_mode<synchronous>, transform_indices = @transform_9, window_bounds = array<i64: 1, 16>}, {pipeline_mode = #tpu.pipeline_mode<synchronous>, transform_indices = @transform_10, window_bounds = array<i64: 16, 96>}, {pipeline_mode = #tpu.pipeline_mode<synchronous>, transform_indices = @transform_11, window_bounds = array<i64: 1, 96>}, {pipeline_mode = #tpu.pipeline_mode<synchronous>, transform_indices = @transform_12, window_bounds = array<i64: 32, 96>}, {pipeline_mode = #tpu.pipeline_mode<synchronous>, transform_indices = @transform_13, window_bounds = array<i64: 1, 96>}, {pipeline_mode = #tpu.pipeline_mode<synchronous>, transform_indices = @transform_14, window_bounds = array<i64: 32, 50>}, {pipeline_mode = #tpu.pipeline_mode<synchronous>, transform_indices = @transform_15, window_bounds = array<i64: 1, 50>}, {pipeline_mode = #tpu.pipeline_mode<synchronous>, transform_indices = @transform_16, window_bounds = array<i64: 50, 4>}, {pipeline_mode = #tpu.pipeline_mode<synchronous>, transform_indices = @transform_17, window_bounds = array<i64: 1, 4>}, {pipeline_mode = #tpu.pipeline_mode<synchronous>, transform_indices = @transform_18, window_bounds = array<i64: 36, 4>}]} {
    %c0 = arith.constant 0 : index
    %c0_0 = arith.constant 0 : index
    %0 = vector.load %arg3[%c0, %c0_0] : memref<36x16xf32, #tpu.memory_space<vmem>>, vector<36x16xf32>
    %c0_1 = arith.constant 0 : index
    %c0_2 = arith.constant 0 : index
    %1 = vector.load %arg5[%c0_1, %c0_2] : memref<16x16xf32, #tpu.memory_space<vmem>>, vector<16x16xf32>
    %cst = arith.constant dense<0.000000e+00> : vector<36x16xf32>
    %2 = tpu.matmul %0, %1, %cst {dimension_numbers = #tpu.dot_dimension_numbers<[1], [0], [0], [1], [0, 0, 1, 1], [], []>} : vector<36x16xf32>, vector<16x16xf32>, vector<36x16xf32> -> vector<36x16xf32>
    %c0_3 = arith.constant 0 : index
    %c0_4 = arith.constant 0 : index
    %3 = vector.load %arg6[%c0_3, %c0_4] : memref<1x16xf32, #tpu.memory_space<vmem>>, vector<1x16xf32>
    %4 = vector.broadcast %3 : vector<1x16xf32> to vector<36x16xf32>
    %5 = arith.addf %2, %4 : vector<36x16xf32>
    %c0_5 = arith.constant 0 : index
    %c0_6 = arith.constant 0 : index
    %6 = vector.load %arg7[%c0_5, %c0_6] : memref<16x16xf32, #tpu.memory_space<vmem>>, vector<16x16xf32>
    %c0_7 = arith.constant 0 : index
    %c0_8 = arith.constant 0 : index
    %7 = vector.load %arg2[%c0_7, %c0_8] : memref<16x48xf32, #tpu.memory_space<vmem>>, vector<16x48xf32>
    %cst_9 = arith.constant dense<0.000000e+00> : vector<16x48xf32>
    %8 = tpu.matmul %6, %7, %cst_9 {dimension_numbers = #tpu.dot_dimension_numbers<[1], [0], [0], [1], [0, 0, 1, 1], [], []>} : vector<16x16xf32>, vector<16x48xf32>, vector<16x48xf32> -> vector<16x48xf32>
    %c0_10 = arith.constant 0 : index
    %c0_11 = arith.constant 0 : index
    %9 = vector.load %arg8[%c0_10, %c0_11] : memref<16x1xf32, #tpu.memory_space<vmem>>, vector<16x1xf32>
    %10 = vector.broadcast %9 : vector<16x1xf32> to vector<16x48xf32>
    %11 = arith.addf %8, %10 : vector<16x48xf32>
    %c0_12 = arith.constant 0 : index
    %c0_13 = arith.constant 0 : index
    %12 = vector.load %arg4[%c0_12, %c0_13] : memref<36x48xf32, #tpu.memory_space<vmem>>, vector<36x48xf32>
    %cst_14 = arith.constant dense<0.000000e+00> : vector<36x48xf32>
    %13 = tpu.matmul %5, %11, %cst_14 {dimension_numbers = #tpu.dot_dimension_numbers<[1], [0], [0], [1], [0, 0, 1, 1], [], []>} : vector<36x16xf32>, vector<16x48xf32>, vector<36x48xf32> -> vector<36x48xf32>
    %cst_15 = arith.constant 2.500000e-01 : f32
    %14 = vector.broadcast %cst_15 : f32 to vector<36x48xf32>
    %15 = arith.mulf %13, %14 : vector<36x48xf32>
    %cst_16 = arith.constant 1.000000e+00 : f32
    %16 = vector.broadcast %cst_16 : f32 to vector<36x48xf32>
    %17 = arith.subf %12, %16 : vector<36x48xf32>
    %cst_17 = arith.constant 1.000000e+09 : f32
    %18 = vector.broadcast %cst_17 : f32 to vector<36x48xf32>
    %19 = arith.mulf %17, %18 : vector<36x48xf32>
    %20 = arith.addf %15, %19 : vector<36x48xf32>
    %cst_18 = arith.constant dense<0xFF800000> : vector<36xf32>
    %21 = vector.multi_reduction <maximumf>, %20, %cst_18 [1] : vector<36x48xf32> to vector<36xf32>
    %22 = vector.shape_cast %21 : vector<36xf32> to vector<36x1xf32>
    %23 = vector.broadcast %22 : vector<36x1xf32> to vector<36x48xf32>
    %24 = arith.subf %20, %23 : vector<36x48xf32>
    %25 = math.exp %24 : vector<36x48xf32>
    %c0_19 = arith.constant 0 : index
    %c0_20 = arith.constant 0 : index
    %26 = vector.load %arg1[%c0_19, %c0_20] : memref<48x8xf32, #tpu.memory_space<vmem>>, vector<48x8xf32>
    %27 = vector.extract_strided_slice %26 {offsets = [0, 4], sizes = [48, 4], strides = [1, 1]} : vector<48x8xf32> to vector<48x4xf32>
    %28 = tpu.concatenate %27, %27 in 1 : vector<48x4xf32>, vector<48x4xf32> -> vector<48x8xf32>
    %29 = arith.mulf %28, %26 : vector<48x8xf32>
    %30 = tpu.concatenate %29, %28 in 1 : vector<48x8xf32>, vector<48x8xf32> -> vector<48x16xf32>
    %cst_21 = arith.constant dense<0.000000e+00> : vector<36x16xf32>
    %31 = tpu.matmul %25, %30, %cst_21 {dimension_numbers = #tpu.dot_dimension_numbers<[1], [0], [0], [1], [0, 0, 1, 1], [], []>} : vector<36x48xf32>, vector<48x16xf32>, vector<36x16xf32> -> vector<36x16xf32>
    %32 = vector.extract_strided_slice %31 {offsets = [0, 0], sizes = [36, 8], strides = [1, 1]} : vector<36x16xf32> to vector<36x8xf32>
    %33 = vector.extract_strided_slice %31 {offsets = [0, 8], sizes = [36, 8], strides = [1, 1]} : vector<36x16xf32> to vector<36x8xf32>
    %cst_22 = arith.constant 1.250000e-01 : f32
    %34 = vector.broadcast %cst_22 : f32 to vector<36x48xf32>
    %35 = arith.mulf %12, %34 : vector<36x48xf32>
    %cst_23 = arith.constant dense<0.000000e+00> : vector<36x8xf32>
    %36 = tpu.matmul %35, %26, %cst_23 {dimension_numbers = #tpu.dot_dimension_numbers<[1], [0], [0], [1], [0, 0, 1, 1], [], []>} : vector<36x48xf32>, vector<48x8xf32>, vector<36x8xf32> -> vector<36x8xf32>
    %cst_24 = arith.constant 1.000000e-30 : f32
    %37 = vector.broadcast %cst_24 : f32 to vector<36x8xf32>
    %38 = arith.maximumf %33, %37 : vector<36x8xf32>
    %39 = tpu.reciprocal %38 {approx = true} : vector<36x8xf32> -> vector<36x8xf32>
    %cst_25 = arith.constant 0.000000e+00 : f32
    %40 = vector.broadcast %cst_25 : f32 to vector<36x8xf32>
    %41 = arith.cmpf ogt, %33, %40 : vector<36x8xf32>
    %42 = arith.mulf %32, %39 : vector<36x8xf32>
    %43 = arith.select %41, %42, %36 : vector<36x8xi1>, vector<36x8xf32>
    %c0_26 = arith.constant 0 : index
    %c0_27 = arith.constant 0 : index
    %44 = vector.load %arg9[%c0_26, %c0_27] : memref<8x16xf32, #tpu.memory_space<vmem>>, vector<8x16xf32>
    %cst_28 = arith.constant dense<0.000000e+00> : vector<36x16xf32>
    %45 = tpu.matmul %43, %44, %cst_28 {dimension_numbers = #tpu.dot_dimension_numbers<[1], [0], [0], [1], [0, 0, 1, 1], [], []>} : vector<36x8xf32>, vector<8x16xf32>, vector<36x16xf32> -> vector<36x16xf32>
    %c0_29 = arith.constant 0 : index
    %c0_30 = arith.constant 0 : index
    %46 = vector.load %arg10[%c0_29, %c0_30] : memref<1x16xf32, #tpu.memory_space<vmem>>, vector<1x16xf32>
    %47 = vector.broadcast %46 : vector<1x16xf32> to vector<36x16xf32>
    %48 = arith.addf %45, %47 : vector<36x16xf32>
    %c0_31 = arith.constant 0 : index
    %c0_32 = arith.constant 0 : index
    %49 = vector.load %arg11[%c0_31, %c0_32] : memref<16x96xf32, #tpu.memory_space<vmem>>, vector<16x96xf32>
    %cst_33 = arith.constant dense<0.000000e+00> : vector<36x96xf32>
    %50 = tpu.matmul %48, %49, %cst_33 {dimension_numbers = #tpu.dot_dimension_numbers<[1], [0], [0], [1], [0, 0, 1, 1], [], []>} : vector<36x16xf32>, vector<16x96xf32>, vector<36x96xf32> -> vector<36x96xf32>
    %c0_34 = arith.constant 0 : index
    %c0_35 = arith.constant 0 : index
    %51 = vector.load %arg12[%c0_34, %c0_35] : memref<1x96xf32, #tpu.memory_space<vmem>>, vector<1x96xf32>
    %52 = vector.broadcast %51 : vector<1x96xf32> to vector<36x96xf32>
    %53 = arith.addf %50, %52 : vector<36x96xf32>
    %c0_36 = arith.constant 0 : index
    %c0_37 = arith.constant 0 : index
    %54 = vector.load %arg13[%c0_36, %c0_37] : memref<32x96xf32, #tpu.memory_space<vmem>>, vector<32x96xf32>
    %c0_38 = arith.constant 0 : index
    %c0_39 = arith.constant 0 : index
    %55 = vector.load %arg14[%c0_38, %c0_39] : memref<1x96xf32, #tpu.memory_space<vmem>>, vector<1x96xf32>
    %56 = vector.extract_strided_slice %53 {offsets = [0, 0], sizes = [6, 96], strides = [1, 1]} : vector<36x96xf32> to vector<6x96xf32>
    %57 = vector.extract_strided_slice %53 {offsets = [30, 0], sizes = [6, 96], strides = [1, 1]} : vector<36x96xf32> to vector<6x96xf32>
    %58 = vector.extract_strided_slice %56 {offsets = [0, 0], sizes = [6, 16], strides = [1, 1]} : vector<6x96xf32> to vector<6x16xf32>
    %59 = vector.extract_strided_slice %57 {offsets = [0, 48], sizes = [6, 16], strides = [1, 1]} : vector<6x96xf32> to vector<6x16xf32>
    %60 = vector.extract_strided_slice %56 {offsets = [0, 16], sizes = [6, 16], strides = [1, 1]} : vector<6x96xf32> to vector<6x16xf32>
    %61 = vector.extract_strided_slice %57 {offsets = [0, 64], sizes = [6, 16], strides = [1, 1]} : vector<6x96xf32> to vector<6x16xf32>
    %62 = tpu.concatenate %58, %59, %60, %61 in 1 : vector<6x16xf32>, vector<6x16xf32>, vector<6x16xf32>, vector<6x16xf32> -> vector<6x64xf32>
    %63 = vector.extract_strided_slice %56 {offsets = [0, 32], sizes = [6, 16], strides = [1, 1]} : vector<6x96xf32> to vector<6x16xf32>
    %64 = vector.extract_strided_slice %57 {offsets = [0, 80], sizes = [6, 16], strides = [1, 1]} : vector<6x96xf32> to vector<6x16xf32>
    %65 = tpu.concatenate %63, %64 in 1 : vector<6x16xf32>, vector<6x16xf32> -> vector<6x32xf32>
    %66 = vector.extract_strided_slice %53 {offsets = [6, 0], sizes = [6, 96], strides = [1, 1]} : vector<36x96xf32> to vector<6x96xf32>
    %67 = vector.extract_strided_slice %53 {offsets = [24, 0], sizes = [6, 96], strides = [1, 1]} : vector<36x96xf32> to vector<6x96xf32>
    %68 = vector.extract_strided_slice %66 {offsets = [0, 0], sizes = [6, 16], strides = [1, 1]} : vector<6x96xf32> to vector<6x16xf32>
    %69 = vector.extract_strided_slice %67 {offsets = [0, 48], sizes = [6, 16], strides = [1, 1]} : vector<6x96xf32> to vector<6x16xf32>
    %70 = vector.extract_strided_slice %66 {offsets = [0, 16], sizes = [6, 16], strides = [1, 1]} : vector<6x96xf32> to vector<6x16xf32>
    %71 = vector.extract_strided_slice %67 {offsets = [0, 64], sizes = [6, 16], strides = [1, 1]} : vector<6x96xf32> to vector<6x16xf32>
    %72 = tpu.concatenate %68, %69, %70, %71 in 1 : vector<6x16xf32>, vector<6x16xf32>, vector<6x16xf32>, vector<6x16xf32> -> vector<6x64xf32>
    %73 = vector.extract_strided_slice %66 {offsets = [0, 32], sizes = [6, 16], strides = [1, 1]} : vector<6x96xf32> to vector<6x16xf32>
    %74 = vector.extract_strided_slice %67 {offsets = [0, 80], sizes = [6, 16], strides = [1, 1]} : vector<6x96xf32> to vector<6x16xf32>
    %75 = tpu.concatenate %73, %74 in 1 : vector<6x16xf32>, vector<6x16xf32> -> vector<6x32xf32>
    %76 = vector.extract_strided_slice %53 {offsets = [12, 0], sizes = [6, 96], strides = [1, 1]} : vector<36x96xf32> to vector<6x96xf32>
    %77 = vector.extract_strided_slice %53 {offsets = [18, 0], sizes = [6, 96], strides = [1, 1]} : vector<36x96xf32> to vector<6x96xf32>
    %78 = vector.extract_strided_slice %76 {offsets = [0, 0], sizes = [6, 16], strides = [1, 1]} : vector<6x96xf32> to vector<6x16xf32>
    %79 = vector.extract_strided_slice %77 {offsets = [0, 48], sizes = [6, 16], strides = [1, 1]} : vector<6x96xf32> to vector<6x16xf32>
    %80 = vector.extract_strided_slice %76 {offsets = [0, 16], sizes = [6, 16], strides = [1, 1]} : vector<6x96xf32> to vector<6x16xf32>
    %81 = vector.extract_strided_slice %77 {offsets = [0, 64], sizes = [6, 16], strides = [1, 1]} : vector<6x96xf32> to vector<6x16xf32>
    %82 = tpu.concatenate %78, %79, %80, %81 in 1 : vector<6x16xf32>, vector<6x16xf32>, vector<6x16xf32>, vector<6x16xf32> -> vector<6x64xf32>
    %83 = vector.extract_strided_slice %76 {offsets = [0, 32], sizes = [6, 16], strides = [1, 1]} : vector<6x96xf32> to vector<6x16xf32>
    %84 = vector.extract_strided_slice %77 {offsets = [0, 80], sizes = [6, 16], strides = [1, 1]} : vector<6x96xf32> to vector<6x16xf32>
    %85 = tpu.concatenate %83, %84 in 1 : vector<6x16xf32>, vector<6x16xf32> -> vector<6x32xf32>
    %86 = vector.extract_strided_slice %53 {offsets = [18, 0], sizes = [6, 96], strides = [1, 1]} : vector<36x96xf32> to vector<6x96xf32>
    %87 = vector.extract_strided_slice %53 {offsets = [12, 0], sizes = [6, 96], strides = [1, 1]} : vector<36x96xf32> to vector<6x96xf32>
    %88 = vector.extract_strided_slice %86 {offsets = [0, 0], sizes = [6, 16], strides = [1, 1]} : vector<6x96xf32> to vector<6x16xf32>
    %89 = vector.extract_strided_slice %87 {offsets = [0, 48], sizes = [6, 16], strides = [1, 1]} : vector<6x96xf32> to vector<6x16xf32>
    %90 = vector.extract_strided_slice %86 {offsets = [0, 16], sizes = [6, 16], strides = [1, 1]} : vector<6x96xf32> to vector<6x16xf32>
    %91 = vector.extract_strided_slice %87 {offsets = [0, 64], sizes = [6, 16], strides = [1, 1]} : vector<6x96xf32> to vector<6x16xf32>
    %92 = tpu.concatenate %88, %89, %90, %91 in 1 : vector<6x16xf32>, vector<6x16xf32>, vector<6x16xf32>, vector<6x16xf32> -> vector<6x64xf32>
    %93 = vector.extract_strided_slice %86 {offsets = [0, 32], sizes = [6, 16], strides = [1, 1]} : vector<6x96xf32> to vector<6x16xf32>
    %94 = vector.extract_strided_slice %87 {offsets = [0, 80], sizes = [6, 16], strides = [1, 1]} : vector<6x96xf32> to vector<6x16xf32>
    %95 = tpu.concatenate %93, %94 in 1 : vector<6x16xf32>, vector<6x16xf32> -> vector<6x32xf32>
    %96 = vector.extract_strided_slice %53 {offsets = [24, 0], sizes = [6, 96], strides = [1, 1]} : vector<36x96xf32> to vector<6x96xf32>
    %97 = vector.extract_strided_slice %53 {offsets = [6, 0], sizes = [6, 96], strides = [1, 1]} : vector<36x96xf32> to vector<6x96xf32>
    %98 = vector.extract_strided_slice %96 {offsets = [0, 0], sizes = [6, 16], strides = [1, 1]} : vector<6x96xf32> to vector<6x16xf32>
    %99 = vector.extract_strided_slice %97 {offsets = [0, 48], sizes = [6, 16], strides = [1, 1]} : vector<6x96xf32> to vector<6x16xf32>
    %100 = vector.extract_strided_slice %96 {offsets = [0, 16], sizes = [6, 16], strides = [1, 1]} : vector<6x96xf32> to vector<6x16xf32>
    %101 = vector.extract_strided_slice %97 {offsets = [0, 64], sizes = [6, 16], strides = [1, 1]} : vector<6x96xf32> to vector<6x16xf32>
    %102 = tpu.concatenate %98, %99, %100, %101 in 1 : vector<6x16xf32>, vector<6x16xf32>, vector<6x16xf32>, vector<6x16xf32> -> vector<6x64xf32>
    %103 = vector.extract_strided_slice %96 {offsets = [0, 32], sizes = [6, 16], strides = [1, 1]} : vector<6x96xf32> to vector<6x16xf32>
    %104 = vector.extract_strided_slice %97 {offsets = [0, 80], sizes = [6, 16], strides = [1, 1]} : vector<6x96xf32> to vector<6x16xf32>
    %105 = tpu.concatenate %103, %104 in 1 : vector<6x16xf32>, vector<6x16xf32> -> vector<6x32xf32>
    %106 = vector.extract_strided_slice %53 {offsets = [30, 0], sizes = [6, 96], strides = [1, 1]} : vector<36x96xf32> to vector<6x96xf32>
    %107 = vector.extract_strided_slice %53 {offsets = [0, 0], sizes = [6, 96], strides = [1, 1]} : vector<36x96xf32> to vector<6x96xf32>
    %108 = vector.extract_strided_slice %106 {offsets = [0, 0], sizes = [6, 16], strides = [1, 1]} : vector<6x96xf32> to vector<6x16xf32>
    %109 = vector.extract_strided_slice %107 {offsets = [0, 48], sizes = [6, 16], strides = [1, 1]} : vector<6x96xf32> to vector<6x16xf32>
    %110 = vector.extract_strided_slice %106 {offsets = [0, 16], sizes = [6, 16], strides = [1, 1]} : vector<6x96xf32> to vector<6x16xf32>
    %111 = vector.extract_strided_slice %107 {offsets = [0, 64], sizes = [6, 16], strides = [1, 1]} : vector<6x96xf32> to vector<6x16xf32>
    %112 = tpu.concatenate %108, %109, %110, %111 in 1 : vector<6x16xf32>, vector<6x16xf32>, vector<6x16xf32>, vector<6x16xf32> -> vector<6x64xf32>
    %113 = vector.extract_strided_slice %106 {offsets = [0, 32], sizes = [6, 16], strides = [1, 1]} : vector<6x96xf32> to vector<6x16xf32>
    %114 = vector.extract_strided_slice %107 {offsets = [0, 80], sizes = [6, 16], strides = [1, 1]} : vector<6x96xf32> to vector<6x16xf32>
    %115 = tpu.concatenate %113, %114 in 1 : vector<6x16xf32>, vector<6x16xf32> -> vector<6x32xf32>
    %cst_40 = arith.constant 0.000000e+00 : f32
    %116 = vector.broadcast %cst_40 : f32 to vector<6x32xf32>
    %cst_41 = arith.constant dense<0.000000e+00> : vector<6x96xf32>
    %117 = tpu.matmul %116, %54, %cst_41 {dimension_numbers = #tpu.dot_dimension_numbers<[1], [0], [0], [1], [0, 0, 1, 1], [], []>} : vector<6x32xf32>, vector<32x96xf32>, vector<6x96xf32> -> vector<6x96xf32>
    %118 = vector.broadcast %55 : vector<1x96xf32> to vector<6x96xf32>
    %119 = arith.addf %117, %118 : vector<6x96xf32>
    %120 = vector.extract_strided_slice %119 {offsets = [0, 0], sizes = [6, 64], strides = [1, 1]} : vector<6x96xf32> to vector<6x64xf32>
    %121 = arith.addf %62, %120 : vector<6x64xf32>
    %122 = arith.negf %121 : vector<6x64xf32>
    %123 = math.exp %122 : vector<6x64xf32>
    %cst_42 = arith.constant 1.000000e+00 : f32
    %124 = vector.broadcast %cst_42 : f32 to vector<6x64xf32>
    %125 = arith.addf %124, %123 : vector<6x64xf32>
    %126 = arith.divf %124, %125 : vector<6x64xf32>
    %127 = vector.extract_strided_slice %126 {offsets = [0, 0], sizes = [6, 32], strides = [1, 1]} : vector<6x64xf32> to vector<6x32xf32>
    %128 = vector.extract_strided_slice %126 {offsets = [0, 32], sizes = [6, 32], strides = [1, 1]} : vector<6x64xf32> to vector<6x32xf32>
    %129 = vector.extract_strided_slice %119 {offsets = [0, 64], sizes = [6, 32], strides = [1, 1]} : vector<6x96xf32> to vector<6x32xf32>
    %130 = arith.mulf %127, %129 : vector<6x32xf32>
    %131 = arith.addf %65, %130 : vector<6x32xf32>
    %132 = math.tanh %131 : vector<6x32xf32>
    %cst_43 = arith.constant 1.000000e+00 : f32
    %133 = vector.broadcast %cst_43 : f32 to vector<6x32xf32>
    %134 = arith.subf %133, %128 : vector<6x32xf32>
    %135 = arith.mulf %134, %132 : vector<6x32xf32>
    %136 = arith.mulf %128, %116 : vector<6x32xf32>
    %137 = arith.addf %135, %136 : vector<6x32xf32>
    %138 = vector.extract_strided_slice %137 {offsets = [0, 0], sizes = [6, 16], strides = [1, 1]} : vector<6x32xf32> to vector<6x16xf32>
    %139 = vector.extract_strided_slice %137 {offsets = [0, 16], sizes = [6, 16], strides = [1, 1]} : vector<6x32xf32> to vector<6x16xf32>
    %cst_44 = arith.constant dense<0.000000e+00> : vector<6x96xf32>
    %140 = tpu.matmul %137, %54, %cst_44 {dimension_numbers = #tpu.dot_dimension_numbers<[1], [0], [0], [1], [0, 0, 1, 1], [], []>} : vector<6x32xf32>, vector<32x96xf32>, vector<6x96xf32> -> vector<6x96xf32>
    %141 = vector.broadcast %55 : vector<1x96xf32> to vector<6x96xf32>
    %142 = arith.addf %140, %141 : vector<6x96xf32>
    %143 = vector.extract_strided_slice %142 {offsets = [0, 0], sizes = [6, 64], strides = [1, 1]} : vector<6x96xf32> to vector<6x64xf32>
    %144 = arith.addf %72, %143 : vector<6x64xf32>
    %145 = arith.negf %144 : vector<6x64xf32>
    %146 = math.exp %145 : vector<6x64xf32>
    %cst_45 = arith.constant 1.000000e+00 : f32
    %147 = vector.broadcast %cst_45 : f32 to vector<6x64xf32>
    %148 = arith.addf %147, %146 : vector<6x64xf32>
    %149 = arith.divf %147, %148 : vector<6x64xf32>
    %150 = vector.extract_strided_slice %149 {offsets = [0, 0], sizes = [6, 32], strides = [1, 1]} : vector<6x64xf32> to vector<6x32xf32>
    %151 = vector.extract_strided_slice %149 {offsets = [0, 32], sizes = [6, 32], strides = [1, 1]} : vector<6x64xf32> to vector<6x32xf32>
    %152 = vector.extract_strided_slice %142 {offsets = [0, 64], sizes = [6, 32], strides = [1, 1]} : vector<6x96xf32> to vector<6x32xf32>
    %153 = arith.mulf %150, %152 : vector<6x32xf32>
    %154 = arith.addf %75, %153 : vector<6x32xf32>
    %155 = math.tanh %154 : vector<6x32xf32>
    %cst_46 = arith.constant 1.000000e+00 : f32
    %156 = vector.broadcast %cst_46 : f32 to vector<6x32xf32>
    %157 = arith.subf %156, %151 : vector<6x32xf32>
    %158 = arith.mulf %157, %155 : vector<6x32xf32>
    %159 = arith.mulf %151, %137 : vector<6x32xf32>
    %160 = arith.addf %158, %159 : vector<6x32xf32>
    %161 = vector.extract_strided_slice %160 {offsets = [0, 0], sizes = [6, 16], strides = [1, 1]} : vector<6x32xf32> to vector<6x16xf32>
    %162 = vector.extract_strided_slice %160 {offsets = [0, 16], sizes = [6, 16], strides = [1, 1]} : vector<6x32xf32> to vector<6x16xf32>
    %cst_47 = arith.constant dense<0.000000e+00> : vector<6x96xf32>
    %163 = tpu.matmul %160, %54, %cst_47 {dimension_numbers = #tpu.dot_dimension_numbers<[1], [0], [0], [1], [0, 0, 1, 1], [], []>} : vector<6x32xf32>, vector<32x96xf32>, vector<6x96xf32> -> vector<6x96xf32>
    %164 = vector.broadcast %55 : vector<1x96xf32> to vector<6x96xf32>
    %165 = arith.addf %163, %164 : vector<6x96xf32>
    %166 = vector.extract_strided_slice %165 {offsets = [0, 0], sizes = [6, 64], strides = [1, 1]} : vector<6x96xf32> to vector<6x64xf32>
    %167 = arith.addf %82, %166 : vector<6x64xf32>
    %168 = arith.negf %167 : vector<6x64xf32>
    %169 = math.exp %168 : vector<6x64xf32>
    %cst_48 = arith.constant 1.000000e+00 : f32
    %170 = vector.broadcast %cst_48 : f32 to vector<6x64xf32>
    %171 = arith.addf %170, %169 : vector<6x64xf32>
    %172 = arith.divf %170, %171 : vector<6x64xf32>
    %173 = vector.extract_strided_slice %172 {offsets = [0, 0], sizes = [6, 32], strides = [1, 1]} : vector<6x64xf32> to vector<6x32xf32>
    %174 = vector.extract_strided_slice %172 {offsets = [0, 32], sizes = [6, 32], strides = [1, 1]} : vector<6x64xf32> to vector<6x32xf32>
    %175 = vector.extract_strided_slice %165 {offsets = [0, 64], sizes = [6, 32], strides = [1, 1]} : vector<6x96xf32> to vector<6x32xf32>
    %176 = arith.mulf %173, %175 : vector<6x32xf32>
    %177 = arith.addf %85, %176 : vector<6x32xf32>
    %178 = math.tanh %177 : vector<6x32xf32>
    %cst_49 = arith.constant 1.000000e+00 : f32
    %179 = vector.broadcast %cst_49 : f32 to vector<6x32xf32>
    %180 = arith.subf %179, %174 : vector<6x32xf32>
    %181 = arith.mulf %180, %178 : vector<6x32xf32>
    %182 = arith.mulf %174, %160 : vector<6x32xf32>
    %183 = arith.addf %181, %182 : vector<6x32xf32>
    %184 = vector.extract_strided_slice %183 {offsets = [0, 0], sizes = [6, 16], strides = [1, 1]} : vector<6x32xf32> to vector<6x16xf32>
    %185 = vector.extract_strided_slice %183 {offsets = [0, 16], sizes = [6, 16], strides = [1, 1]} : vector<6x32xf32> to vector<6x16xf32>
    %cst_50 = arith.constant dense<0.000000e+00> : vector<6x96xf32>
    %186 = tpu.matmul %183, %54, %cst_50 {dimension_numbers = #tpu.dot_dimension_numbers<[1], [0], [0], [1], [0, 0, 1, 1], [], []>} : vector<6x32xf32>, vector<32x96xf32>, vector<6x96xf32> -> vector<6x96xf32>
    %187 = vector.broadcast %55 : vector<1x96xf32> to vector<6x96xf32>
    %188 = arith.addf %186, %187 : vector<6x96xf32>
    %189 = vector.extract_strided_slice %188 {offsets = [0, 0], sizes = [6, 64], strides = [1, 1]} : vector<6x96xf32> to vector<6x64xf32>
    %190 = arith.addf %92, %189 : vector<6x64xf32>
    %191 = arith.negf %190 : vector<6x64xf32>
    %192 = math.exp %191 : vector<6x64xf32>
    %cst_51 = arith.constant 1.000000e+00 : f32
    %193 = vector.broadcast %cst_51 : f32 to vector<6x64xf32>
    %194 = arith.addf %193, %192 : vector<6x64xf32>
    %195 = arith.divf %193, %194 : vector<6x64xf32>
    %196 = vector.extract_strided_slice %195 {offsets = [0, 0], sizes = [6, 32], strides = [1, 1]} : vector<6x64xf32> to vector<6x32xf32>
    %197 = vector.extract_strided_slice %195 {offsets = [0, 32], sizes = [6, 32], strides = [1, 1]} : vector<6x64xf32> to vector<6x32xf32>
    %198 = vector.extract_strided_slice %188 {offsets = [0, 64], sizes = [6, 32], strides = [1, 1]} : vector<6x96xf32> to vector<6x32xf32>
    %199 = arith.mulf %196, %198 : vector<6x32xf32>
    %200 = arith.addf %95, %199 : vector<6x32xf32>
    %201 = math.tanh %200 : vector<6x32xf32>
    %cst_52 = arith.constant 1.000000e+00 : f32
    %202 = vector.broadcast %cst_52 : f32 to vector<6x32xf32>
    %203 = arith.subf %202, %197 : vector<6x32xf32>
    %204 = arith.mulf %203, %201 : vector<6x32xf32>
    %205 = arith.mulf %197, %183 : vector<6x32xf32>
    %206 = arith.addf %204, %205 : vector<6x32xf32>
    %207 = vector.extract_strided_slice %206 {offsets = [0, 0], sizes = [6, 16], strides = [1, 1]} : vector<6x32xf32> to vector<6x16xf32>
    %208 = vector.extract_strided_slice %206 {offsets = [0, 16], sizes = [6, 16], strides = [1, 1]} : vector<6x32xf32> to vector<6x16xf32>
    %cst_53 = arith.constant dense<0.000000e+00> : vector<6x96xf32>
    %209 = tpu.matmul %206, %54, %cst_53 {dimension_numbers = #tpu.dot_dimension_numbers<[1], [0], [0], [1], [0, 0, 1, 1], [], []>} : vector<6x32xf32>, vector<32x96xf32>, vector<6x96xf32> -> vector<6x96xf32>
    %210 = vector.broadcast %55 : vector<1x96xf32> to vector<6x96xf32>
    %211 = arith.addf %209, %210 : vector<6x96xf32>
    %212 = vector.extract_strided_slice %211 {offsets = [0, 0], sizes = [6, 64], strides = [1, 1]} : vector<6x96xf32> to vector<6x64xf32>
    %213 = arith.addf %102, %212 : vector<6x64xf32>
    %214 = arith.negf %213 : vector<6x64xf32>
    %215 = math.exp %214 : vector<6x64xf32>
    %cst_54 = arith.constant 1.000000e+00 : f32
    %216 = vector.broadcast %cst_54 : f32 to vector<6x64xf32>
    %217 = arith.addf %216, %215 : vector<6x64xf32>
    %218 = arith.divf %216, %217 : vector<6x64xf32>
    %219 = vector.extract_strided_slice %218 {offsets = [0, 0], sizes = [6, 32], strides = [1, 1]} : vector<6x64xf32> to vector<6x32xf32>
    %220 = vector.extract_strided_slice %218 {offsets = [0, 32], sizes = [6, 32], strides = [1, 1]} : vector<6x64xf32> to vector<6x32xf32>
    %221 = vector.extract_strided_slice %211 {offsets = [0, 64], sizes = [6, 32], strides = [1, 1]} : vector<6x96xf32> to vector<6x32xf32>
    %222 = arith.mulf %219, %221 : vector<6x32xf32>
    %223 = arith.addf %105, %222 : vector<6x32xf32>
    %224 = math.tanh %223 : vector<6x32xf32>
    %cst_55 = arith.constant 1.000000e+00 : f32
    %225 = vector.broadcast %cst_55 : f32 to vector<6x32xf32>
    %226 = arith.subf %225, %220 : vector<6x32xf32>
    %227 = arith.mulf %226, %224 : vector<6x32xf32>
    %228 = arith.mulf %220, %206 : vector<6x32xf32>
    %229 = arith.addf %227, %228 : vector<6x32xf32>
    %230 = vector.extract_strided_slice %229 {offsets = [0, 0], sizes = [6, 16], strides = [1, 1]} : vector<6x32xf32> to vector<6x16xf32>
    %231 = vector.extract_strided_slice %229 {offsets = [0, 16], sizes = [6, 16], strides = [1, 1]} : vector<6x32xf32> to vector<6x16xf32>
    %cst_56 = arith.constant dense<0.000000e+00> : vector<6x96xf32>
    %232 = tpu.matmul %229, %54, %cst_56 {dimension_numbers = #tpu.dot_dimension_numbers<[1], [0], [0], [1], [0, 0, 1, 1], [], []>} : vector<6x32xf32>, vector<32x96xf32>, vector<6x96xf32> -> vector<6x96xf32>
    %233 = vector.broadcast %55 : vector<1x96xf32> to vector<6x96xf32>
    %234 = arith.addf %232, %233 : vector<6x96xf32>
    %235 = vector.extract_strided_slice %234 {offsets = [0, 0], sizes = [6, 64], strides = [1, 1]} : vector<6x96xf32> to vector<6x64xf32>
    %236 = arith.addf %112, %235 : vector<6x64xf32>
    %237 = arith.negf %236 : vector<6x64xf32>
    %238 = math.exp %237 : vector<6x64xf32>
    %cst_57 = arith.constant 1.000000e+00 : f32
    %239 = vector.broadcast %cst_57 : f32 to vector<6x64xf32>
    %240 = arith.addf %239, %238 : vector<6x64xf32>
    %241 = arith.divf %239, %240 : vector<6x64xf32>
    %242 = vector.extract_strided_slice %241 {offsets = [0, 0], sizes = [6, 32], strides = [1, 1]} : vector<6x64xf32> to vector<6x32xf32>
    %243 = vector.extract_strided_slice %241 {offsets = [0, 32], sizes = [6, 32], strides = [1, 1]} : vector<6x64xf32> to vector<6x32xf32>
    %244 = vector.extract_strided_slice %234 {offsets = [0, 64], sizes = [6, 32], strides = [1, 1]} : vector<6x96xf32> to vector<6x32xf32>
    %245 = arith.mulf %242, %244 : vector<6x32xf32>
    %246 = arith.addf %115, %245 : vector<6x32xf32>
    %247 = math.tanh %246 : vector<6x32xf32>
    %cst_58 = arith.constant 1.000000e+00 : f32
    %248 = vector.broadcast %cst_58 : f32 to vector<6x32xf32>
    %249 = arith.subf %248, %243 : vector<6x32xf32>
    %250 = arith.mulf %249, %247 : vector<6x32xf32>
    %251 = arith.mulf %243, %229 : vector<6x32xf32>
    %252 = arith.addf %250, %251 : vector<6x32xf32>
    %253 = vector.extract_strided_slice %252 {offsets = [0, 0], sizes = [6, 16], strides = [1, 1]} : vector<6x32xf32> to vector<6x16xf32>
    %254 = vector.extract_strided_slice %252 {offsets = [0, 16], sizes = [6, 16], strides = [1, 1]} : vector<6x32xf32> to vector<6x16xf32>
    %255 = tpu.concatenate %138, %254 in 1 : vector<6x16xf32>, vector<6x16xf32> -> vector<6x32xf32>
    %256 = tpu.concatenate %161, %231 in 1 : vector<6x16xf32>, vector<6x16xf32> -> vector<6x32xf32>
    %257 = tpu.concatenate %184, %208 in 1 : vector<6x16xf32>, vector<6x16xf32> -> vector<6x32xf32>
    %258 = tpu.concatenate %207, %185 in 1 : vector<6x16xf32>, vector<6x16xf32> -> vector<6x32xf32>
    %259 = tpu.concatenate %230, %162 in 1 : vector<6x16xf32>, vector<6x16xf32> -> vector<6x32xf32>
    %260 = tpu.concatenate %253, %139 in 1 : vector<6x16xf32>, vector<6x16xf32> -> vector<6x32xf32>
    %261 = tpu.concatenate %255, %256, %257, %258, %259, %260 in 0 : vector<6x32xf32>, vector<6x32xf32>, vector<6x32xf32>, vector<6x32xf32>, vector<6x32xf32>, vector<6x32xf32> -> vector<36x32xf32>
    %c0_59 = arith.constant 0 : index
    %c0_60 = arith.constant 0 : index
    %262 = vector.load %arg15[%c0_59, %c0_60] : memref<32x50xf32, #tpu.memory_space<vmem>>, vector<32x50xf32>
    %cst_61 = arith.constant dense<0.000000e+00> : vector<36x50xf32>
    %263 = tpu.matmul %261, %262, %cst_61 {dimension_numbers = #tpu.dot_dimension_numbers<[1], [0], [0], [1], [0, 0, 1, 1], [], []>} : vector<36x32xf32>, vector<32x50xf32>, vector<36x50xf32> -> vector<36x50xf32>
    %c0_62 = arith.constant 0 : index
    %c0_63 = arith.constant 0 : index
    %264 = vector.load %arg16[%c0_62, %c0_63] : memref<1x50xf32, #tpu.memory_space<vmem>>, vector<1x50xf32>
    %265 = vector.broadcast %264 : vector<1x50xf32> to vector<36x50xf32>
    %266 = arith.addf %263, %265 : vector<36x50xf32>
    %cst_64 = arith.constant 0.000000e+00 : f32
    %267 = vector.broadcast %cst_64 : f32 to vector<36x50xf32>
    %268 = arith.maximumf %266, %267 : vector<36x50xf32>
    %c0_65 = arith.constant 0 : index
    %c0_66 = arith.constant 0 : index
    %269 = vector.load %arg17[%c0_65, %c0_66] : memref<50x4xf32, #tpu.memory_space<vmem>>, vector<50x4xf32>
    %cst_67 = arith.constant dense<0.000000e+00> : vector<36x4xf32>
    %270 = tpu.matmul %268, %269, %cst_67 {dimension_numbers = #tpu.dot_dimension_numbers<[1], [0], [0], [1], [0, 0, 1, 1], [], []>} : vector<36x50xf32>, vector<50x4xf32>, vector<36x4xf32> -> vector<36x4xf32>
    %c0_68 = arith.constant 0 : index
    %c0_69 = arith.constant 0 : index
    %271 = vector.load %arg18[%c0_68, %c0_69] : memref<1x4xf32, #tpu.memory_space<vmem>>, vector<1x4xf32>
    %272 = vector.broadcast %271 : vector<1x4xf32> to vector<36x4xf32>
    %273 = arith.addf %270, %272 : vector<36x4xf32>
    %c0_70 = arith.constant 0 : index
    %c0_71 = arith.constant 0 : index
    %274 = vector.load %arg19[%c0_70, %c0_71] : memref<36x4xf32, #tpu.memory_space<vmem>>, vector<36x4xf32>
    tpu.vector_store %arg19[%c0_70, %c0_71], %273 {strides = array<i32>} : memref<36x4xf32, #tpu.memory_space<vmem>>, vector<36x4xf32>,
    return
  }
  func.func @transform_0(%arg0: i32) -> (i32, i32) {
    %c0_i32 = arith.constant 0 : i32
    %c0_i32_0 = arith.constant 0 : i32
    %c0_i32_1 = arith.constant 0 : i32
    return %c0_i32, %c0_i32_0 : i32, i32
  }
  func.func @transform_1(%arg0: i32) -> (i32, i32) {
    %c0_i32 = arith.constant 0 : i32
    %c0_i32_0 = arith.constant 0 : i32
    %c0_i32_1 = arith.constant 0 : i32
    return %c0_i32, %c0_i32_0 : i32, i32
  }
  func.func @transform_2(%arg0: i32) -> (i32, i32) {
    %c0_i32 = arith.constant 0 : i32
    %c0_i32_0 = arith.constant 0 : i32
    %c0_i32_1 = arith.constant 0 : i32
    return %c0_i32, %c0_i32_0 : i32, i32
  }
  func.func @transform_3(%arg0: i32) -> (i32, i32) {
    %c0_i32 = arith.constant 0 : i32
    %c0_i32_0 = arith.constant 0 : i32
    %c0_i32_1 = arith.constant 0 : i32
    return %c0_i32, %c0_i32_0 : i32, i32
  }
  func.func @transform_4(%arg0: i32) -> (i32, i32) {
    %c0_i32 = arith.constant 0 : i32
    %c0_i32_0 = arith.constant 0 : i32
    %c0_i32_1 = arith.constant 0 : i32
    return %c0_i32, %c0_i32_0 : i32, i32
  }
  func.func @transform_5(%arg0: i32) -> (i32, i32) {
    %c0_i32 = arith.constant 0 : i32
    %c0_i32_0 = arith.constant 0 : i32
    %c0_i32_1 = arith.constant 0 : i32
    return %c0_i32, %c0_i32_0 : i32, i32
  }
  func.func @transform_6(%arg0: i32) -> (i32, i32) {
    %c0_i32 = arith.constant 0 : i32
    %c0_i32_0 = arith.constant 0 : i32
    %c0_i32_1 = arith.constant 0 : i32
    return %c0_i32, %c0_i32_0 : i32, i32
  }
  func.func @transform_7(%arg0: i32) -> (i32, i32) {
    %c0_i32 = arith.constant 0 : i32
    %c0_i32_0 = arith.constant 0 : i32
    %c0_i32_1 = arith.constant 0 : i32
    return %c0_i32, %c0_i32_0 : i32, i32
  }
  func.func @transform_8(%arg0: i32) -> (i32, i32) {
    %c0_i32 = arith.constant 0 : i32
    %c0_i32_0 = arith.constant 0 : i32
    %c0_i32_1 = arith.constant 0 : i32
    return %c0_i32, %c0_i32_0 : i32, i32
  }
  func.func @transform_9(%arg0: i32) -> (i32, i32) {
    %c0_i32 = arith.constant 0 : i32
    %c0_i32_0 = arith.constant 0 : i32
    %c0_i32_1 = arith.constant 0 : i32
    return %c0_i32, %c0_i32_0 : i32, i32
  }
  func.func @transform_10(%arg0: i32) -> (i32, i32) {
    %c0_i32 = arith.constant 0 : i32
    %c0_i32_0 = arith.constant 0 : i32
    %c0_i32_1 = arith.constant 0 : i32
    return %c0_i32, %c0_i32_0 : i32, i32
  }
  func.func @transform_11(%arg0: i32) -> (i32, i32) {
    %c0_i32 = arith.constant 0 : i32
    %c0_i32_0 = arith.constant 0 : i32
    %c0_i32_1 = arith.constant 0 : i32
    return %c0_i32, %c0_i32_0 : i32, i32
  }
  func.func @transform_12(%arg0: i32) -> (i32, i32) {
    %c0_i32 = arith.constant 0 : i32
    %c0_i32_0 = arith.constant 0 : i32
    %c0_i32_1 = arith.constant 0 : i32
    return %c0_i32, %c0_i32_0 : i32, i32
  }
  func.func @transform_13(%arg0: i32) -> (i32, i32) {
    %c0_i32 = arith.constant 0 : i32
    %c0_i32_0 = arith.constant 0 : i32
    %c0_i32_1 = arith.constant 0 : i32
    return %c0_i32, %c0_i32_0 : i32, i32
  }
  func.func @transform_14(%arg0: i32) -> (i32, i32) {
    %c0_i32 = arith.constant 0 : i32
    %c0_i32_0 = arith.constant 0 : i32
    %c0_i32_1 = arith.constant 0 : i32
    return %c0_i32, %c0_i32_0 : i32, i32
  }
  func.func @transform_15(%arg0: i32) -> (i32, i32) {
    %c0_i32 = arith.constant 0 : i32
    %c0_i32_0 = arith.constant 0 : i32
    %c0_i32_1 = arith.constant 0 : i32
    return %c0_i32, %c0_i32_0 : i32, i32
  }
  func.func @transform_16(%arg0: i32) -> (i32, i32) {
    %c0_i32 = arith.constant 0 : i32
    %c0_i32_0 = arith.constant 0 : i32
    %c0_i32_1 = arith.constant 0 : i32
    return %c0_i32, %c0_i32_0 : i32, i32
  }
  func.func @transform_17(%arg0: i32) -> (i32, i32) {
    %c0_i32 = arith.constant 0 : i32
    %c0_i32_0 = arith.constant 0 : i32
    %c0_i32_1 = arith.constant 0 : i32
    return %c0_i32, %c0_i32_0 : i32, i32
  }
  func.func @transform_18(%arg0: i32) -> (i32, i32) {
    %c0_i32 = arith.constant 0 : i32
    %c0_i32_0 = arith.constant 0 : i32
    %c0_i32_1 = arith.constant 0 : i32
    return %c0_i32, %c0_i32_0 : i32, i32
  }
}

</mosaic_0001>

<bundles_post_ra>
// kernel: tile.7
= control target key start
LH: loop header
LB: loop body
LE: loop exit
PB: predicated region body
PF: predicated region fallthrough
CT: control target
= control target key end

     0   :  { %vm3_vm0 = vcmask 392192   ;;  %s86_s0 = inlined_call_operand.vmem [shape: f32[6,6,48], index: 0, kind: input, shape index: {}]   ;;  %s87_s1 = inlined_call_operand.vmem [shape: f32[36,48], index: 1, kind: output, shape index: {}]  }
   0x1   :  { %v2_v0 = vld [vmem:[%s86_s0] sm:$0x3f]   ;;  %v30_v1 = vld [vmem:[%s86_s0 + $0x8] sm:$0x3f]   ;;  %v32_v2 = vld [vmem:[%s86_s0 + $0x10] sm:$0x3f]  }
   0x2   :  { %4 = vst.msk [vmem:[%s87_s1] sm:$0x3f] %vm3_vm0, %v2_v0   ;;  %31 = vst.msk [vmem:[%s87_s1 + $0x6] sm:$0x3f] %vm3_vm0, %v30_v1   ;;  %v34_v3 = vld [vmem:[%s86_s0 + $0x18] sm:$0x3f]  }
   0x3   :  { %33 = vst.msk [vmem:[%s87_s1 + $0xc] sm:$0x3f] %vm3_vm0, %v32_v2   ;;  %v36_v4 = vld [vmem:[%s86_s0 + $0x20] sm:$0x3f]   ;;  %v38_v5 = vld [vmem:[%s86_s0 + $0x28] sm:$0x3f]  }
   0x4   :  { %35 = vst.msk [vmem:[%s87_s1 + $0x12] sm:$0x3f] %vm3_vm0, %v34_v3   ;;  %37 = vst.msk [vmem:[%s87_s1 + $0x18] sm:$0x3f] %vm3_vm0, %v36_v4  }
   0x5   :  { %39 = vst.msk [vmem:[%s87_s1 + $0x1e] sm:$0x3f] %vm3_vm0, %v38_v5  }

// kernel: enc_mtan_rnn_forward.1
= control target key start
LH: loop header
LB: loop body
LE: loop exit
PB: predicated region body
PF: predicated region fallthrough
CT: control target
= control target key end

     0   :  { %v2701_v1 = vmov 0.0   ;;  %vm73_vm0 = vcmask 130048   ;;  %vm2702_vm1 = vmmov 0   ;;  %v2703_v11 = vmov 0   ;;  %s2704_s21 = smov 124   ;;  %s2710_s30 = smov 112   ;;  %s3555_s1 = inlined_call_operand.vmem [shape: f32[16,48], index: 1, kind: input, shape index: {}]   ;;  %s3556_s4 = inlined_call_operand.vmem [shape: f32[16,16], index: 4, kind: input, shape index: {}]   ;;  %s3557_s6 = inlined_call_operand.vmem [shape: f32[16,16], index: 6, kind: input, shape index: {}]   ;;  %s3558_s2 = inlined_call_operand.vmem [shape: f32[36,16], index: 2, kind: input, shape index: {}]   ;;  %s3559_s7 = inlined_call_operand.vmem [shape: f32[16,1], index: 7, kind: input, shape index: {}]   ;;  %s3560_s0 = inlined_call_operand.vmem [shape: f32[48,8], index: 0, kind: input, shape index: {}]   ;;  %s3561_s5 = inlined_call_operand.vmem [shape: f32[1,16], index: 5, kind: input, shape index: {}]   ;;  %s3562_s3 = inlined_call_operand.vmem [shape: f32[36,48], index: 3, kind: input, shape index: {}]   ;;  %s3563_s8 = inlined_call_operand.vmem [shape: f32[8,16], index: 8, kind: input, shape index: {}]   ;;  %s3564_s10 = inlined_call_operand.vmem [shape: f32[16,96], index: 10, kind: input, shape index: {}]   ;;  %s3565_s12 = inlined_call_operand.vmem [shape: f32[32,96], index: 12, kind: input, shape index: {}]   ;;  %s3566_s9 = inlined_call_operand.vmem [shape: f32[1,16], index: 9, kind: input, shape index: {}]   ;;  %s3567_s11 = inlined_call_operand.vmem [shape: f32[1,96], index: 11, kind: input, shape index: {}]   ;;  %s3568_s13 = inlined_call_operand.vmem [shape: f32[1,96], index: 13, kind: input, shape index: {}]   ;;  %s3569_s14 = inlined_call_operand.vmem [shape: f32[32,50], index: 14, kind: input, shape index: {}]   ;;  %s3570_s16 = inlined_call_operand.vmem [shape: f32[50,4], index: 16, kind: input, shape index: {}]   ;;  %s3571_s15 = inlined_call_operand.vmem [shape: f32[1,50], index: 15, kind: input, shape index: {}]   ;;  %s3572_s17 = inlined_call_operand.vmem [shape: f32[1,4], index: 17, kind: input, shape index: {}]   ;;  %s3573_s18 = inlined_call_operand.vmem [shape: f32[36,4], index: 18, kind: output, shape index: {}]  }
   0x1   :  { %3577 = sst [smem:[#allocation2_spill]] %s3555_s1  ;;  %2350 = vmatprep.subr.mxu0 %v2701_v1  ;;  %2354 = vmatprep.mubr.msk.f32.mxu0 %vm2702_vm1, %v2701_v1  ;;  %v59_v7 = vld [vmem:[%s3558_s2] sm:$0xff]  ;;  %v184_v8 = vld [vmem:[%s3559_s7 + $0x8] sm:$0xff]  ;;  %v61_v14 = vld [vmem:[%s3558_s2 + $0x10] sm:$0xff]  ;;  %vm468_vm2 = vcmask 31744   ;;  %vm505_vm3 = vcmask 64512  }
   0x2   :  { %3578 = sst [smem:[#allocation3_spill]] %s3556_s4  ;;  %v2839_v9 = vld [vmem:[%s3560_s0 + $0x28] sm:$0xff]  ;;  %2626 = vset.pattern.permute.xlu0 %v2703_v11  ;;  %v183_v12 = vld [vmem:[%s3559_s7] sm:$0xff]  ;;  %v2871_v15 = vld [vmem:[%s3560_s0 + $0x18] sm:$0xff]  ;;  %vm406_vm4 = vcmask 392192   ;;  %vm419_vm5 = vcmask 388096  }
   0x3   :  { %3579 = sst [smem:[#allocation4_spill]] %s3557_s6  ;;  %v60_v10 = vld [vmem:[%s3558_s2 + $0x8] sm:$0xff]  ;;  %192 = vperm.xlu0 %2626, %v184_v8   ;;  %460 = vrot.lane.b32.xlu1 %v2839_v9, %s2704_s21  ;;  %v2855_v13 = vld [vmem:[%s3560_s0 + $0x20] sm:$0xff]  ;;  %v2876_v16 = vld [vmem:[%s3560_s0 + $0x10] sm:$0xff]  ;;  %vm1056_vm11 = vcmask 1041408   ;;  %vm1071_vm12 = vcmask 261120  }
   0x4   :  { %s3580_s29 = sld [smem:[#allocation2_spill]]  ;;  %v62_v17 = vld [vmem:[%s3558_s2 + $0x18] sm:$0xff]  ;;  %v63_v18 = vld [vmem:[%s3558_s2 + $0x20] sm:$0xf]  ;;  %v2898_v19 = vld [vmem:[%s3560_s0 + $0x8] sm:$0xff]  ;;  %s2705_s2 = smov 8  }
   0x5   :  { %s3581_s19 = sld [smem:[#allocation3_spill]]  ;;  %v2903_v20 = vld [vmem:[%s3560_s0] sm:$0xff]  ;;  %s2711_s1 = smov 32   ;;  %vm1131_vm13 = vcmask 1045504   ;;  %vm1542_vm14 = vcmask 1043456   ;;  %vm2059_vm15 = vcmask 408576  }
   0x6   :  { %s3582_s6 = sld [smem:[#allocation4_spill]]  ;;  %v2178_v31 = vld [vmem:[%s3561_s5] ss:$0 sm:$0xff] }
   0x7   :  { %187 = vperm.xlu0 %2626, %v183_v12   ;;  %458 = vrot.lane.b32.xlu1 %v2855_v13, %s2704_s21  ;;  %v280_v8 = vld [vmem:[%s3562_s3 + $0x20] sm:$0xf] }
   0x8   :  { %v2998_v11 = vld [vmem:[%s3562_s3] sm:$0xff] }
   0x9   :  { %v2191_v12 = vadd.f32 -1.0, %v2998_v11 }
   0xa   :  { %v182_v0 = vld [vmem:[%s3580_s29 + $0x8] sm:$0xff]  ;;  %v181_v3 = vld [vmem:[%s3580_s29] sm:$0xff]  ;;  %s2707_s29 = smov 16  }
   0xb   :  { %v65_v2 = vld [vmem:[%s3581_s19 + $0x8] sm:$0xff]  ;;  %2369 = vmatprep.subr.mxu1 %v182_v0  ;;  %v64_v5 = vld [vmem:[%s3581_s19] sm:$0xff]  ;;  %456 = vrot.lane.b32.xlu0 %v2871_v15, %s2704_s21 }
   0xc   :  { %2351 = vmatpush3.msra.mxu0 %v65_v2  ;;  %v179_v4 = vld [vmem:[%s3582_s6] sm:$0xff]  ;;  %2370 = vmatpush3.msra.mxu1 %v182_v0  ;;  %v180_v6 = vld [vmem:[%s3582_s6 + $0x8] sm:$0xff] }
   0xd   :  { %2352 = vmatprep.subr.mxu0 %v2701_v1  ;;  %2371 = vmatprep.subr.mxu1 %v181_v3  ;;  %v277_v2 = vld [vmem:[%s3562_s3 + $0x8] sm:$0xff] }
   0xe   :  { %2373 = vmatprep.mubr.msk.f32.mxu1 %vm73_vm0, %v179_v4  ;;  %2372 = vmatpush3.msra.mxu1 %v181_v3  ;;  %v618_v3 = vmul.f32 0.125, %v277_v2  ;;  %v278_v4 = vld [vmem:[%s3562_s3 + $0x10] sm:$0xff] }
   0xf   :  { %2353 = vmatpush3.msra.mxu0 %v64_v5  ;;  %2374 = vmatmul.mubr.msk.f32.vlgmr.msra.gmra.mxu1 %vm73_vm0, %v180_v6  ;;  %v619_v5 = vmul.f32 0.125, %v278_v4  ;;  %v279_v6 = vld [vmem:[%s3562_s3 + $0x18] sm:$0xff]  ;;  %s2706_s3 = smov 120  }
  0x10   :  { %2355 = vmatmul.mubr.msk.f32.vlgmr.msra.gmra.mxu0 %vm73_vm0, %v59_v7  ;;  %2376 = vmatprep.subr.mxu1 %v2701_v1  ;;  %v620_v7 = vmul.f32 0.125, %v279_v6 }
  0x11   :  { %2357 = vmatprep.mubr.msk.f32.mxu0 %vm2702_vm1, %v2701_v1  ;;  %2380 = vmatprep.mubr.msk.f32.mxu1 %vm2702_vm1, %v2701_v1 }
  0x12   :  { %2395 = vmatprep.subr.mxu0 %v2701_v1  ;;  %454 = vrot.lane.b32.xlu1 %v2876_v16, %s2704_s21 }
  0x13   :  { %452 = vrot.lane.b32.xlu0 %v2898_v19, %s2704_s21 }
  0x14   :  { %2358 = vmatmul.mubr.msk.f32.gmra.mxu0 %vm73_vm0, %v60_v10  ;;  %v621_v10 = vmul.f32 0.125, %v280_v8 }
  0x15   :  { %2360 = vmatprep.mubr.msk.f32.mxu0 %vm2702_vm1, %v2701_v1 }
  0x16   :  { %450 = vrot.lane.b32.xlu1 %v2903_v20, %s2704_s21 }
  0x18   :  { %2361 = vmatmul.mubr.msk.f32.gmra.mxu0 %vm73_vm0, %v61_v14  ;;  %v396_v14 = vmul.f32 1e+09, %v2191_v12 }
  0x19   :  { %2363 = vmatprep.mubr.msk.f32.mxu0 %vm2702_vm1, %v2701_v1 }
  0x1c   :  { %2364 = vmatmul.mubr.msk.f32.gmra.mxu0 %vm73_vm0, %v62_v17  ;;  %v2192_v17 = vadd.f32 -1.0, %v277_v2 }
  0x1d   :  { %2366 = vmatprep.mubr.msk.f32.mxu0 %vm2702_vm1, %v2701_v1 }
  0x20   :  { %2367 = vmatmul.mubr.msk.f32.gmra.mxu0 %vm73_vm0, %v63_v18 }
  0x21   :  { %2407 = vmatprep.mubr.msk.f32.mxu0 %vm2702_vm1, %v2701_v1 }
  0x75   :  { %v461_v21 = vpop.permute.xlu1 %460 }
  0x76   :  { %v474_v22 = vsel %vm468_vm2, %v461_v21, %v2839_v9 }
  0x77   :  { %497 = vrot.lane.b32.xlu0 %v474_v22, %s2705_s2  ;;  %v480_v52 = vmul.f32 %v474_v22, %v2839_v9 }
  0x79   :  { %v459_v23 = vpop.permute.xlu1 %458 }
  0x7a   :  { %v473_v24 = vsel %vm468_vm2, %v459_v23, %v2855_v13 }
  0x7b   :  { %495 = vrot.lane.b32.xlu1 %v473_v24, %s2705_s2  ;;  %v479_v55 = vmul.f32 %v473_v24, %v2855_v13  ;;  %v397_v24 = vmul.f32 1e+09, %v2192_v17 }
  0x7e   :  { %v193_v26 = vpop.permute.xlu0 %192 }
  0x82   :  { %v188_v28 = vpop.permute.xlu0 %187 }
  0x84   :  { %v455_v25 = vpop.permute.xlu1 %454 }
  0x85   :  { %v2915_v27 = vsel %vm468_vm2, %v455_v25, %v2876_v16  ;;  %v2193_v25 = vadd.f32 -1.0, %v278_v4 }
  0x86   :  { %491 = vrot.lane.b32.xlu0 %v2915_v27, %s2705_s2  ;;  %v457_v29 = vpop.permute.xlu0 %456  ;;  %v477_v60 = vmul.f32 %v2915_v27, %v2876_v16 }
  0x87   :  { %v472_v30 = vsel %vm468_vm2, %v457_v29, %v2871_v15 }
  0x88   :  { %493 = vrot.lane.b32.xlu1 %v472_v30, %s2705_s2  ;;  %v2957_v53 = vpop.permute.xlu1 %450  ;;  %v478_v59 = vmul.f32 %v472_v30, %v2871_v15 }
  0x8a   :  { %v2954_v51 = vpop.permute.xlu0 %452 }
  0xcf   :  { %v2375_v32 = vpop.f32.mrf.mxu1 }
  0xd0   :  { %v155_v33 = vpop.f32.mrf.mxu0  ;;  %v273_v34 = vadd.f32 %v2375_v32, %v193_v26  ;;  %v2194_v32 = vadd.f32 -1.0, %v279_v6 }
  0xd1   :  { %v156_v35 = vadd.f32 %v2178_v31, %v155_v33  ;;  %v267_v36 = vpop.f32.mrf.mxu1 }
  0xd2   :  { %v2356_v37 = vpop.f32.mrf.mxu0  ;;  %v268_v38 = vadd.f32 %v267_v36, %v188_v28  ;;  %2377 = vmatpush3.msra.mxu1 %v273_v34 }
  0xd3   :  { %2378 = vmatprep.subr.mxu1 %v2701_v1 }
  0xd4   :  { %v160_v39 = vpop.f32.mrf.mxu0  ;;  %2379 = vmatpush3.msra.mxu1 %v268_v38  ;;  %v399_v38 = vmul.f32 1e+09, %v2194_v32 }
  0xd5   :  { %v161_v40 = vadd.f32 %v2178_v31, %v160_v39  ;;  %2381 = vmatmul.mubr.msk.f32.vlgmr.msra.gmra.mxu1 %vm73_vm0, %v156_v35  ;;  %2603 = vmatprep.subr.mxu1 %v2701_v1  ;;  %v2195_v39 = vadd.f32 -1.0, %v280_v8 }
  0xd6   :  { %v2359_v41 = vpop.f32.mrf.mxu0  ;;  %2383 = vmatprep.mubr.msk.f32.mxu1 %vm2702_vm1, %v2701_v1  ;;  %2609 = vmatpush3.msra.mxu1 %v2839_v9 }
  0xd7   :  { %2604 = vmatprep.subr.mxu1 %v2701_v1 }
  0xd8   :  { %v165_v42 = vpop.f32.mrf.mxu0  ;;  %2610 = vmatpush3.msra.mxu1 %v2855_v13 }
  0xd9   :  { %v166_v43 = vadd.f32 %v2178_v31, %v165_v42  ;;  %2384 = vmatmul.mubr.msk.f32.gmra.mxu1 %vm73_vm0, %v161_v40  ;;  %2605 = vmatprep.subr.mxu1 %v2701_v1 }
  0xda   :  { %v2362_v44 = vpop.f32.mrf.mxu0  ;;  %2386 = vmatprep.mubr.msk.f32.mxu1 %vm2702_vm1, %v2701_v1  ;;  %2611 = vmatpush3.msra.mxu1 %v2871_v15 }
  0xdb   :  { %2606 = vmatprep.subr.mxu1 %v2701_v1 }
  0xdc   :  { %v170_v45 = vpop.f32.mrf.mxu0  ;;  %2612 = vmatpush3.msra.mxu1 %v2876_v16 }
  0xdd   :  { %v171_v46 = vadd.f32 %v2178_v31, %v170_v45  ;;  %2387 = vmatmul.mubr.msk.f32.gmra.mxu1 %vm73_vm0, %v166_v43  ;;  %2607 = vmatprep.subr.mxu1 %v2701_v1  ;;  %v400_v45 = vmul.f32 1e+09, %v2195_v39 }
  0xde   :  { %v2365_v47 = vpop.f32.mrf.mxu0  ;;  %2389 = vmatprep.mubr.msk.f32.mxu1 %vm2702_vm1, %v2701_v1  ;;  %2613 = vmatpush3.msra.mxu1 %v2898_v19 }
  0xdf   :  { %2608 = vmatprep.subr.mxu1 %v2701_v1 }
  0xe0   :  { %v175_v48 = vpop.f32.mrf.mxu0  ;;  %2614 = vmatpush3.msra.mxu1 %v2903_v20 }
  0xe1   :  { %v176_v49 = vadd.f32 %v2178_v31, %v175_v48  ;;  %2390 = vmatmul.mubr.msk.f32.gmra.mxu1 %vm73_vm0, %v171_v46  ;;  %2466 = vmatprep.subr.mxu1 %v2701_v1  ;;  %v398_v31 = vmul.f32 1e+09, %v2193_v25 }
  0xe2   :  { %v2368_v50 = vpop.f32.mrf.mxu0  ;;  %2392 = vmatprep.mubr.msk.f32.mxu1 %vm2702_vm1, %v2701_v1 }
  0xe5   :  { %2393 = vmatmul.mubr.msk.f32.gmra.mxu1 %vm73_vm0, %v176_v49 }
  0xe6   :  { %2437 = vmatprep.mubr.msk.f32.mxu1 %vm2702_vm1, %v2701_v1 }
  0xe9   :  { %v498_v54 = vpop.permute.xlu0 %497  ;;  %2438 = vmatmul.mubr.msk.f32.vlgmr.msra.gmra.mxu1 %vm406_vm4, %v618_v3 }
  0xea   :  { %v511_v56 = vsel %vm505_vm3, %v480_v52, %v498_v54  ;;  %2440 = vmatprep.mubr.msk.f32.mxu1 %vm2702_vm1, %v2701_v1  ;;  %v470_v54 = vsel %vm468_vm2, %v2954_v51, %v2898_v19 }
  0xeb   :  { %2396 = vmatpush3.msra.mxu0 %v511_v56 }
  0xec   :  { %2397 = vmatprep.subr.mxu0 %v2701_v1 }
  0xed   :  { %v496_v57 = vpop.permute.xlu1 %495  ;;  %2441 = vmatmul.mubr.msk.f32.gmra.mxu1 %vm406_vm4, %v619_v5 }
  0xee   :  { %v510_v58 = vsel %vm505_vm3, %v479_v55, %v496_v57  ;;  %2443 = vmatprep.mubr.msk.f32.mxu1 %vm2702_vm1, %v2701_v1  ;;  %v469_v55 = vsel %vm468_vm2, %v2957_v53, %v2903_v20  ;;  %v476_v53 = vmul.f32 %v470_v54, %v2898_v19 }
  0xef   :  { %2398 = vmatpush3.msra.mxu0 %v510_v58  ;;  %v475_v8 = vmul.f32 %v469_v55, %v2903_v20 }
  0xf0   :  { %2399 = vmatprep.subr.mxu0 %v2701_v1 }
  0xf1   :  { %2444 = vmatmul.mubr.msk.f32.gmra.mxu1 %vm406_vm4, %v620_v7 }
  0xf2   :  { %2446 = vmatprep.mubr.msk.f32.mxu1 %vm2702_vm1, %v2701_v1 }
  0xf5   :  { %2447 = vmatmul.mubr.msk.f32.gmra.mxu1 %vm406_vm4, %v621_v10 }
  0xf6   :  { %2470 = vmatprep.mubr.msk.f32.mxu1 %vm2702_vm1, %v2701_v1 }
  0xf8   :  { %v492_v61 = vpop.permute.xlu0 %491 }
  0xf9   :  { %v508_v0 = vsel %vm505_vm3, %v477_v60, %v492_v61 }
  0xfa   :  { %v494_v62 = vpop.permute.xlu1 %493 }
  0xfb   :  { %v509_v63 = vsel %vm505_vm3, %v478_v59, %v494_v62 }
  0xfc   :  { %2400 = vmatpush3.msra.mxu0 %v509_v63 }
  0xfd   :  { %2401 = vmatprep.subr.mxu0 %v2701_v1 }
  0xfe   :  { %2402 = vmatpush3.msra.mxu0 %v508_v0 }
  0xff   :  { %2403 = vmatprep.subr.mxu0 %v2701_v1 }
 0x195   :  { %v362_v18 = vpop.f32.mrf.mxu1 }
 0x196   :  { %v386_v21 = vmul.f32 0.25, %v362_v18 }
 0x197   :  { %v2382_v22 = vpop.f32.mrf.mxu1 }
 0x198   :  { %v401_v23 = vadd.f32 %v396_v14, %v386_v21 }
 0x199   :  { %v367_v26 = vpop.f32.mrf.mxu1 }
 0x19a   :  { %v387_v27 = vmul.f32 0.25, %v367_v26  ;;  %v407_v28 = vsel %vm406_vm4, %v401_v23, -inf }
 0x19b   :  { %v2385_v29 = vpop.f32.mrf.mxu1  ;;  %408 = vmax.xlane.f32.xlu0 %v407_v28 }
 0x19c   :  { %v402_v30 = vadd.f32 %v397_v24, %v387_v27 }
 0x19d   :  { %v372_v33 = vpop.f32.mrf.mxu1 }
 0x19e   :  { %v388_v34 = vmul.f32 0.25, %v372_v33  ;;  %v410_v35 = vsel %vm406_vm4, %v402_v30, -inf }
 0x19f   :  { %v2388_v36 = vpop.f32.mrf.mxu1  ;;  %411 = vmax.xlane.f32.xlu1 %v410_v35 }
 0x1a0   :  { %v403_v37 = vadd.f32 %v398_v31, %v388_v34 }
 0x1a1   :  { %v377_v40 = vpop.f32.mrf.mxu1 }
 0x1a2   :  { %v389_v41 = vmul.f32 0.25, %v377_v40  ;;  %v413_v42 = vsel %vm406_vm4, %v403_v37, -inf }
 0x1a3   :  { %v2391_v43 = vpop.f32.mrf.mxu1  ;;  %414 = vmax.xlane.f32.xlu0 %v413_v42 }
 0x1a4   :  { %v404_v44 = vadd.f32 %v399_v38, %v389_v41 }
 0x1a5   :  { %v382_v46 = vpop.f32.mrf.mxu1 }
 0x1a6   :  { %v390_v47 = vmul.f32 0.25, %v382_v46  ;;  %v416_v48 = vsel %vm406_vm4, %v404_v44, -inf }
 0x1a7   :  { %v2394_v49 = vpop.f32.mrf.mxu1  ;;  %417 = vmax.xlane.f32.xlu0 %v416_v48 }
 0x1a8   :  { %v405_v50 = vadd.f32 %v400_v45, %v390_v47 }
 0x1a9   :  { %v708_v24 = vpop.f32.mrf.mxu1 }
 0x1aa   :  { %v420_v52 = vsel %vm419_vm5, %v405_v50, -inf }
 0x1ab   :  { %421 = vmax.xlane.f32.xlu1 %v420_v52  ;;  %v2439_v27 = vpop.f32.mrf.mxu1 }
 0x1ad   :  { %v713_v29 = vpop.f32.mrf.mxu1 }
 0x1af   :  { %v2442_v32 = vpop.f32.mrf.mxu1 }
 0x1b1   :  { %v718_v34 = vpop.f32.mrf.mxu1 }
 0x1b3   :  { %v2445_v38 = vpop.f32.mrf.mxu1 }
 0x1b5   :  { %v723_v40 = vpop.f32.mrf.mxu1 }
 0x1b7   :  { %v2448_v43 = vpop.f32.mrf.mxu1 }
 0x1bc   :  { %489 = vrot.lane.b32.xlu1 %v470_v54, %s2705_s2 }
 0x1bd   :  { %487 = vrot.lane.b32.xlu0 %v469_v55, %s2705_s2  ;;  %v812_v55 = vld [vmem:[%s3563_s8] sm:$0xff] }
 0x224   :  { %v409_v56 = vpop.xlane.xlu0 %408 }
 0x225   :  { %v423_v57 = vsub.f32 %v401_v23, %v409_v56 }
 0x227   :  { %v428_v59 = vmul.f32 1.442695, %v423_v57 }
 0x228   :  { %v412_v58 = vpop.xlane.xlu1 %411 }
 0x229   :  { %v424_v60 = vsub.f32 %v402_v30, %v412_v58  ;;  %2627 = vpow2.f32 %v428_v59 }
 0x22b   :  { %v430_v62 = vmul.f32 1.442695, %v424_v60 }
 0x22c   :  { %v415_v61 = vpop.xlane.xlu0 %414 }
 0x22d   :  { %v425_v63 = vsub.f32 %v403_v37, %v415_v61  ;;  %2629 = vpow2.f32 %v430_v62 }
 0x22f   :  { %v432_v51 = vmul.f32 1.442695, %v425_v63 }
 0x230   :  { %v418_v0 = vpop.xlane.xlu0 %417 }
 0x231   :  { %v426_v2 = vsub.f32 %v404_v44, %v418_v0  ;;  %2631 = vpow2.f32 %v432_v51 }
 0x233   :  { %v434_v4 = vmul.f32 1.442695, %v426_v2 }
 0x234   :  { %v422_v3 = vpop.xlane.xlu1 %421  ;;  %v488_v6 = vpop.permute.xlu0 %487 }
 0x235   :  { %v427_v5 = vsub.f32 %v405_v50, %v422_v3  ;;  %2633 = vpow2.f32 %v434_v4  ;;  %v506_v12 = vsel %vm505_vm3, %v475_v8, %v488_v6  ;;  %v935_v4 = vld [vmem:[%s3564_s10] sm:$0xff] }
 0x236   :  { %v2628_v17 = vpop.eup %2627 }
 0x237   :  { %v436_v14 = vmul.f32 1.442695, %v427_v5 }
 0x238   :  { %v490_v7 = vpop.permute.xlu1 %489 }
 0x239   :  { %v507_v10 = vsel %vm505_vm3, %v476_v53, %v490_v7  ;;  %2635 = vpow2.f32 %v436_v14  ;;  %v936_v53 = vld [vmem:[%s3564_s10 + $0x8] sm:$0xff] }
 0x23a   :  { %2404 = vmatpush3.msra.mxu0 %v507_v10  ;;  %v2630_v18 = vpop.eup %2629  ;;  %2467 = vmatpush3.msra.mxu1 %v936_v53 }
 0x23b   :  { %2405 = vmatprep.subr.mxu0 %v2701_v1  ;;  %2468 = vmatprep.subr.mxu1 %v2701_v1 }
 0x23c   :  { %2406 = vmatpush3.msra.mxu0 %v506_v12  ;;  %2469 = vmatpush3.msra.mxu1 %v935_v4 }
 0x23d   :  { %2408 = vmatmul.mubr.msk.f32.vlgmr.msra.gmra.mxu0 %vm406_vm4, %v2628_v17  ;;  %2422 = vmatprep.subr.mxu0 %v2701_v1 }
 0x23e   :  { %2410 = vmatprep.mubr.msk.f32.mxu0 %vm2702_vm1, %v2701_v1  ;;  %2423 = vmatpush3.msra.mxu0 %v2839_v9  ;;  %v2632_v21 = vpop.eup %2631 }
 0x23f   :  { %2424 = vmatprep.subr.mxu0 %v2701_v1  ;;  %2496 = vmatprep.subr.mxu1 %v2701_v1 }
 0x240   :  { %2425 = vmatpush3.msra.mxu0 %v2855_v13 }
 0x241   :  { %2411 = vmatmul.mubr.msk.f32.gmra.mxu0 %vm406_vm4, %v2630_v18  ;;  %2426 = vmatprep.subr.mxu0 %v2701_v1 }
 0x242   :  { %2413 = vmatprep.mubr.msk.f32.mxu0 %vm2702_vm1, %v2701_v1  ;;  %2427 = vmatpush3.msra.mxu0 %v2871_v15  ;;  %v2634_v9 = vpop.eup %2633  ;;  %v617_v15 = vmul.f32 0.125, %v2998_v11 }
 0x243   :  { %2428 = vmatprep.subr.mxu0 %v2701_v1 }
 0x244   :  { %2429 = vmatpush3.msra.mxu0 %v2876_v16 }
 0x245   :  { %2414 = vmatmul.mubr.msk.f32.gmra.mxu0 %vm406_vm4, %v2632_v21  ;;  %2430 = vmatprep.subr.mxu0 %v2701_v1 }
 0x246   :  { %2416 = vmatprep.mubr.msk.f32.mxu0 %vm2702_vm1, %v2701_v1  ;;  %2431 = vmatpush3.msra.mxu0 %v2898_v19  ;;  %v2636_v13 = vpop.eup %2635 }
 0x247   :  { %2432 = vmatprep.subr.mxu0 %v2701_v1 }
 0x248   :  { %2433 = vmatpush3.msra.mxu0 %v2903_v20 }
 0x249   :  { %2417 = vmatmul.mubr.msk.f32.gmra.mxu0 %vm406_vm4, %v2634_v9  ;;  %2449 = vmatprep.subr.mxu0 %v2701_v1 }
 0x24a   :  { %2419 = vmatprep.mubr.msk.f32.mxu0 %vm2702_vm1, %v2701_v1 }
 0x24d   :  { %2420 = vmatmul.mubr.msk.f32.gmra.mxu0 %vm406_vm4, %v2636_v13 }
 0x24e   :  { %2434 = vmatprep.mubr.msk.f32.mxu0 %vm2702_vm1, %v2701_v1 }
 0x251   :  { %2435 = vmatmul.mubr.msk.f32.vlgmr.msra.gmra.mxu0 %vm406_vm4, %v617_v15 }
 0x252   :  { %2451 = vmatprep.mubr.msk.f32.mxu0 %vm2702_vm1, %v2701_v1  ;;  %2450 = vmatpush3.msra.mxu0 %v812_v55 }
 0x253   :  { %2485 = vmatprep.subr.mxu0 %v2701_v1 }
 0x2fd   :  { %v3050_v16 = vpop.f32.mrf.mxu0 }
 0x2fe   :  { %v727_v19 = vmax.f32 %v3050_v16, 1e-30  ;;  %vm737_vm6 = vcmp.gt.f32.partialorder %v3050_v16, 0.0 }
 0x2ff   :  { %v2409_v20 = vpop.f32.mrf.mxu0 }
 0x300   :  { %2637 = vrcp.f32 %v727_v19  ;;  %v3132_v19 = vld [vmem:[%s3565_s12 + $0x10] sm:$0xff]  ;;  %v3139_v20 = vld [vmem:[%s3565_s12 + $0x8] sm:$0xff] }
 0x301   :  { %v3053_v22 = vpop.f32.mrf.mxu0 }
 0x302   :  { %v728_v11 = vmax.f32 %v3053_v22, 1e-30  ;;  %vm738_vm7 = vcmp.gt.f32.partialorder %v3053_v22, 0.0 }
 0x303   :  { %v2412_v23 = vpop.f32.mrf.mxu0 }
 0x304   :  { %2639 = vrcp.f32 %v728_v11  ;;  %v2206_v11 = vld [vmem:[%s3566_s9] ss:$0 sm:$0xff] }
 0x305   :  { %v3056_v25 = vpop.f32.mrf.mxu0 }
 0x306   :  { %v729_v26 = vmax.f32 %v3056_v25, 1e-30  ;;  %vm739_vm8 = vcmp.gt.f32.partialorder %v3056_v25, 0.0 }
 0x307   :  { %v2415_v28 = vpop.f32.mrf.mxu0 }
 0x308   :  { %2641 = vrcp.f32 %v729_v26 }
 0x309   :  { %v3059_v30 = vpop.f32.mrf.mxu0 }
 0x30a   :  { %v730_v31 = vmax.f32 %v3059_v30, 1e-30  ;;  %vm740_vm9 = vcmp.gt.f32.partialorder %v3059_v30, 0.0 }
 0x30b   :  { %v2418_v33 = vpop.f32.mrf.mxu0 }
 0x30c   :  { %2643 = vrcp.f32 %v730_v31 }
 0x30d   :  { %v2638_v35 = vpop.eup %2637  ;;  %v3062_v36 = vpop.f32.mrf.mxu0 }
 0x30e   :  { %v731_v37 = vmax.f32 %v3062_v36, 1e-30  ;;  %747 = vrot.lane.b32.xlu1 %v2638_v35, %s2706_s3  ;;  %vm741_vm10 = vcmp.gt.f32.partialorder %v3062_v36, 0.0 }
 0x30f   :  { %v2421_v39 = vpop.f32.mrf.mxu0 }
 0x310   :  { %2645 = vrcp.f32 %v731_v37 }
 0x311   :  { %v2640_v41 = vpop.eup %2639  ;;  %v703_v42 = vpop.f32.mrf.mxu0 }
 0x312   :  { %749 = vrot.lane.b32.xlu0 %v2640_v41, %s2706_s3 }
 0x313   :  { %v2436_v44 = vpop.f32.mrf.mxu0 }
 0x315   :  { %v2642_v45 = vpop.eup %2641 }
 0x316   :  { %751 = vrot.lane.b32.xlu1 %v2642_v45, %s2706_s3 }
 0x319   :  { %v2644_v46 = vpop.eup %2643 }
 0x31a   :  { %753 = vrot.lane.b32.xlu0 %v2644_v46, %s2706_s3 }
 0x31d   :  { %v2646_v47 = vpop.eup %2645 }
 0x31e   :  { %755 = vrot.lane.b32.xlu1 %v2646_v47, %s2706_s3 }
 0x322   :  { %792 = vrot.lane.b32.xlu1 %v703_v42, %s2705_s2  ;;  %v3193_v42 = vld [vmem:[%s3568_s13] ss:$0 sm:$0xff]  ;;  %s2709_s13 = smov 96  }
 0x326   :  { %794 = vrot.lane.b32.xlu1 %v708_v24, %s2705_s2 }
 0x32a   :  { %796 = vrot.lane.b32.xlu1 %v713_v29, %s2705_s2 }
 0x32e   :  { %798 = vrot.lane.b32.xlu1 %v718_v34, %s2705_s2 }
 0x332   :  { %800 = vrot.lane.b32.xlu1 %v723_v40, %s2705_s2  ;;  %v2212_v40 = vld [vmem:[%s3567_s11] ss:$0 sm:$0xff]  ;;  %s2708_s11 = smov 64  }
 0x380   :  { %v748_v48 = vpop.permute.xlu1 %747 }
 0x381   :  { %v762_v49 = vmul.f32 %v748_v48, %v3050_v16  ;;  %v3125_v16 = vld [vmem:[%s3565_s12 + $0x18] sm:$0xff] }
 0x383   :  { %772 = vrot.lane.b32.xlu0 %v762_v49, %s2705_s2 }
 0x384   :  { %v750_v50 = vpop.permute.xlu0 %749 }
 0x385   :  { %v763_v52 = vmul.f32 %v750_v50, %v3053_v22  ;;  %v3146_v22 = vld [vmem:[%s3565_s12] sm:$0xff] }
 0x387   :  { %774 = vrot.lane.b32.xlu0 %v763_v52, %s2705_s2 }
 0x388   :  { %v752_v54 = vpop.permute.xlu1 %751 }
 0x389   :  { %v764_v56 = vmul.f32 %v752_v54, %v3056_v25 }
 0x38b   :  { %776 = vrot.lane.b32.xlu0 %v764_v56, %s2705_s2 }
 0x38c   :  { %v754_v57 = vpop.permute.xlu0 %753 }
 0x38d   :  { %v765_v58 = vmul.f32 %v754_v57, %v3059_v30 }
 0x38f   :  { %778 = vrot.lane.b32.xlu0 %v765_v58, %s2705_s2 }
 0x390   :  { %v756_v59 = vpop.permute.xlu1 %755 }
 0x391   :  { %v766_v60 = vmul.f32 %v756_v59, %v3062_v36 }
 0x393   :  { %780 = vrot.lane.b32.xlu0 %v766_v60, %s2705_s2 }
 0x394   :  { %v793_v61 = vpop.permute.xlu1 %792 }
 0x398   :  { %v795_v62 = vpop.permute.xlu1 %794 }
 0x39c   :  { %v797_v51 = vpop.permute.xlu1 %796 }
 0x3a0   :  { %v799_v6 = vpop.permute.xlu1 %798 }
 0x3a4   :  { %v801_v12 = vpop.permute.xlu1 %800 }
 0x3f5   :  { %v773_v63 = vpop.permute.xlu0 %772 }
 0x3f6   :  { %v807_v0 = vsel %vm737_vm6, %v773_v63, %v793_v61 }
 0x3f7   :  { %825 = vrot.lane.b32.xlu0 %v807_v0, %s2706_s3 }
 0x3f9   :  { %v775_v2 = vpop.permute.xlu0 %774 }
 0x3fa   :  { %v808_v3 = vsel %vm738_vm7, %v775_v2, %v795_v62 }
 0x3fb   :  { %827 = vrot.lane.b32.xlu1 %v808_v3, %s2706_s3 }
 0x3fd   :  { %v777_v5 = vpop.permute.xlu0 %776 }
 0x3fe   :  { %v809_v7 = vsel %vm739_vm8, %v777_v5, %v797_v51 }
 0x3ff   :  { %829 = vrot.lane.b32.xlu0 %v809_v7, %s2706_s3 }
 0x401   :  { %v779_v8 = vpop.permute.xlu0 %778 }
 0x402   :  { %v810_v10 = vsel %vm740_vm9, %v779_v8, %v799_v6 }
 0x403   :  { %831 = vrot.lane.b32.xlu1 %v810_v10, %s2706_s3 }
 0x405   :  { %v781_v14 = vpop.permute.xlu0 %780 }
 0x406   :  { %v811_v17 = vsel %vm741_vm10, %v781_v14, %v801_v12 }
 0x407   :  { %833 = vrot.lane.b32.xlu0 %v811_v17, %s2706_s3 }
 0x469   :  { %v826_v18 = vpop.permute.xlu0 %825 }
 0x46a   :  { %2452 = vmatmul.mubr.msk.f32.vlgmr.msra.gmra.mxu0 %vm505_vm3, %v826_v18 }
 0x46b   :  { %2454 = vmatprep.mubr.msk.f32.mxu0 %vm2702_vm1, %v2701_v1  ;;  %2486 = vmatpush3.msra.mxu0 %v3125_v16 }
 0x46c   :  { %2487 = vmatprep.subr.mxu0 %v2701_v1 }
 0x46d   :  { %v828_v21 = vpop.permute.xlu1 %827  ;;  %2488 = vmatpush3.msra.mxu0 %v3132_v19 }
 0x46e   :  { %2455 = vmatmul.mubr.msk.f32.gmra.mxu0 %vm505_vm3, %v828_v21  ;;  %2489 = vmatprep.subr.mxu0 %v2701_v1 }
 0x46f   :  { %2457 = vmatprep.mubr.msk.f32.mxu0 %vm2702_vm1, %v2701_v1  ;;  %2490 = vmatpush3.msra.mxu0 %v3139_v20 }
 0x470   :  { %2491 = vmatprep.subr.mxu0 %v2701_v1 }
 0x471   :  { %v830_v9 = vpop.permute.xlu0 %829  ;;  %2492 = vmatpush3.msra.mxu0 %v3146_v22 }
 0x472   :  { %2458 = vmatmul.mubr.msk.f32.gmra.mxu0 %vm505_vm3, %v830_v9  ;;  %2507 = vmatprep.subr.mxu0 %v2701_v1 }
 0x473   :  { %2460 = vmatprep.mubr.msk.f32.mxu0 %vm2702_vm1, %v2701_v1 }
 0x475   :  { %v832_v13 = vpop.permute.xlu1 %831 }
 0x476   :  { %2461 = vmatmul.mubr.msk.f32.gmra.mxu0 %vm505_vm3, %v832_v13 }
 0x477   :  { %2463 = vmatprep.mubr.msk.f32.mxu0 %vm2702_vm1, %v2701_v1 }
 0x479   :  { %v834_v15 = vpop.permute.xlu0 %833 }
 0x47a   :  { %2464 = vmatmul.mubr.msk.f32.gmra.mxu0 %vm505_vm3, %v834_v15 }
 0x47b   :  { %2493 = vmatprep.mubr.msk.f32.mxu0 %vm2702_vm1, %v2701_v1 }
 0x47e   :  { %2494 = vmatmul.mubr.f32.vlgmr.msra.gmra.mxu0 %v2701_v1 }
 0x47f   :  { %2508 = vmatpush3.msra.mxu0 %v3125_v16  ;;  %2515 = vmatprep.mubr.msk.f32.mxu0 %vm2702_vm1, %v2701_v1 }
 0x480   :  { %2509 = vmatprep.subr.mxu0 %v2701_v1 }
 0x481   :  { %2510 = vmatpush3.msra.mxu0 %v3132_v19 }
 0x482   :  { %2511 = vmatprep.subr.mxu0 %v2701_v1 }
 0x483   :  { %2512 = vmatpush3.msra.mxu0 %v3139_v20 }
 0x484   :  { %2513 = vmatprep.subr.mxu0 %v2701_v1 }
 0x485   :  { %2514 = vmatpush3.msra.mxu0 %v3146_v22 }
 0x486   :  { %2529 = vmatprep.subr.mxu0 %v2701_v1 }
 0x52a   :  { %v911_v23 = vpop.f32.mrf.mxu0 }
 0x52b   :  { %v912_v24 = vadd.f32 %v2206_v11, %v911_v23 }
 0x52c   :  { %v2453_v25 = vpop.f32.mrf.mxu0 }
 0x52d   :  { %2471 = vmatmul.mubr.msk.f32.vlgmr.msra.gmra.mxu1 %vm73_vm0, %v912_v24 }
 0x52e   :  { %v916_v26 = vpop.f32.mrf.mxu0  ;;  %2473 = vmatprep.mubr.msk.f32.mxu1 %vm2702_vm1, %v2701_v1  ;;  %2497 = vmatpush3.msra.mxu1 %v3125_v16 }
 0x52f   :  { %v917_v27 = vadd.f32 %v2206_v11, %v916_v26  ;;  %2498 = vmatprep.subr.mxu1 %v2701_v1 }
 0x530   :  { %v2456_v28 = vpop.f32.mrf.mxu0  ;;  %2499 = vmatpush3.msra.mxu1 %v3132_v19 }
 0x531   :  { %2474 = vmatmul.mubr.msk.f32.gmra.mxu1 %vm73_vm0, %v917_v27  ;;  %2500 = vmatprep.subr.mxu1 %v2701_v1 }
 0x532   :  { %v921_v29 = vpop.f32.mrf.mxu0  ;;  %2476 = vmatprep.mubr.msk.f32.mxu1 %vm2702_vm1, %v2701_v1  ;;  %2501 = vmatpush3.msra.mxu1 %v3139_v20 }
 0x533   :  { %v922_v30 = vadd.f32 %v2206_v11, %v921_v29  ;;  %2502 = vmatprep.subr.mxu1 %v2701_v1 }
 0x534   :  { %v2459_v31 = vpop.f32.mrf.mxu0  ;;  %2503 = vmatpush3.msra.mxu1 %v3146_v22 }
 0x535   :  { %2477 = vmatmul.mubr.msk.f32.gmra.mxu1 %vm73_vm0, %v922_v30  ;;  %2518 = vmatprep.subr.mxu1 %v2701_v1 }
 0x536   :  { %v926_v32 = vpop.f32.mrf.mxu0  ;;  %2479 = vmatprep.mubr.msk.f32.mxu1 %vm2702_vm1, %v2701_v1 }
 0x537   :  { %v927_v33 = vadd.f32 %v2206_v11, %v926_v32 }
 0x538   :  { %v2462_v34 = vpop.f32.mrf.mxu0 }
 0x539   :  { %2480 = vmatmul.mubr.msk.f32.gmra.mxu1 %vm73_vm0, %v927_v33 }
 0x53a   :  { %v931_v35 = vpop.f32.mrf.mxu0  ;;  %2482 = vmatprep.mubr.msk.f32.mxu1 %vm2702_vm1, %v2701_v1 }
 0x53b   :  { %v932_v36 = vadd.f32 %v2206_v11, %v931_v35 }
 0x53c   :  { %v2465_v37 = vpop.f32.mrf.mxu0 }
 0x53d   :  { %2483 = vmatmul.mubr.msk.f32.gmra.mxu1 %vm73_vm0, %v932_v36 }
 0x53e   :  { %2504 = vmatprep.mubr.msk.f32.mxu1 %vm2702_vm1, %v2701_v1  ;;  %v1269_v38 = vpop.f32.mrf.mxu0 }
 0x53f   :  { %v1270_v45 = vadd.f32 %v3193_v42, %v1269_v38 }
 0x540   :  { %v2495_v39 = vpop.f32.mrf.mxu0 }
 0x5ed   :  { %v1025_v41 = vpop.f32.mrf.mxu1 }
 0x5ee   :  { %v3195_v43 = vadd.f32 %v2212_v40, %v1025_v41 }
 0x5ef   :  { %v2472_v44 = vpop.f32.mrf.mxu1 }
 0x5f0   :  { %1064 = vrot.lane.b32.xlu0 %v3195_v43, %s2707_s29 }
 0x5f1   :  { %v1030_v46 = vpop.f32.mrf.mxu1 }
 0x5f2   :  { %v3200_v47 = vadd.f32 %v2212_v40, %v1030_v46 }
 0x5f3   :  { %v2475_v48 = vpop.f32.mrf.mxu1 }
 0x5f4   :  { %1281 = vrot.lane.b32.xlu0 %v1270_v45, %s2708_s11 }
 0x5f5   :  { %v1035_v49 = vpop.f32.mrf.mxu1 }
 0x5f6   :  { %v3203_v50 = vadd.f32 %v2212_v40, %v1035_v49 }
 0x5f7   :  { %v2478_v52 = vpop.f32.mrf.mxu1 }
 0x5f9   :  { %v1040_v54 = vpop.f32.mrf.mxu1 }
 0x5fa   :  { %v3205_v56 = vadd.f32 %v2212_v40, %v1040_v54 }
 0x5fb   :  { %v2481_v55 = vpop.f32.mrf.mxu1 }
 0x5fc   :  { %v1057_v60 = vrot.slane %v3205_v56, 6  ;;  %v1081_v13 = vrot.slane %v3205_v56, 2 }
 0x5fd   :  { %v1045_v57 = vpop.f32.mrf.mxu1 }
 0x5fe   :  { %v3207_v58 = vadd.f32 %v2212_v40, %v1045_v57 }
 0x5ff   :  { %v2484_v59 = vpop.f32.mrf.mxu1 }
 0x600   :  { %v1058_v61 = vrot.slane %v3207_v58, 6 }
 0x602   :  { %v1059_v62 = vsel %vm1056_vm11, %v1057_v60, %v1058_v61 }
 0x603   :  { %1077 = vrot.lane.b32.xlu0 %v1059_v62, %s2708_s11  ;;  %1060 = vrot.lane.b32.xlu1 %v1059_v62, %s2709_s13 }
 0x607   :  { %1067 = vrot.lane.b32.xlu1 %v1059_v62, %s2710_s30 }
 0x60b   :  { %1074 = vrot.lane.b32.xlu1 %v3195_v43, %s2709_s13 }
 0x662   :  { %v1065_v51 = vpop.permute.xlu0 %1064 }
 0x666   :  { %v1282_v8 = vpop.permute.xlu0 %1281 }
 0x675   :  { %v1061_v63 = vpop.permute.xlu1 %1060  ;;  %v1078_v14 = vpop.permute.xlu0 %1077 }
 0x676   :  { %v1070_v0 = vsel %vm73_vm0, %v3195_v43, %v1061_v63 }
 0x677   :  { %v1072_v2 = vsel %vm1071_vm12, %v1070_v0, %v1065_v51 }
 0x679   :  { %v1068_v3 = vpop.permute.xlu1 %1067 }
 0x67a   :  { %v1073_v53 = vsel %vm406_vm4, %v1072_v2, %v1068_v3 }
 0x67b   :  { %v1273_v4 = vadd.f32 %v1270_v45, %v1073_v53 }
 0x67d   :  { %v2219_v5 = vmul.f32 -1.442695, %v1273_v4  ;;  %v3221_v10 = vpop.permute.xlu1 %1074  ;;  %v1107_v4 = vrot.slane %v3203_v50, 6 }
 0x67e   :  { %v1080_v18 = vsel %vm73_vm0, %v3221_v10, %v1078_v14 }
 0x67f   :  { %2647 = vpow2.f32 %v2219_v5 }
 0x68c   :  { %v2648_v6 = vpop.eup %2647 }
 0x68d   :  { %v1277_v7 = vadd.f32 1.0, %v2648_v6 }
 0x68f   :  { %2649 = vrcp.f32 %v1277_v7 }
 0x69c   :  { %v2650_v12 = vpop.eup %2649 }
 0x69d   :  { %v1284_v17 = vmul.f32 %v2650_v12, %v1282_v8  ;;  %v1287_v15 = vsub.f32 1.0, %v2650_v12  ;;  %v1293_v23 = vmul.f32 0.0, %v2650_v12 }
 0x69f   :  { %v1285_v21 = vadd.f32 %v1284_v17, %v1080_v18 }
 0x6a1   :  { %2651 = vtanh.f32 %v1285_v21 }
 0x6ae   :  { %v2652_v9 = vpop.eup %2651 }
 0x6af   :  { %1289 = vrot.lane.b32.xlu1 %v2652_v9, %s2711_s1 }
 0x6b3   :  { %1082 = vrot.lane.b32.xlu1 %v1081_v13, %s2709_s13 }
 0x6b7   :  { %1089 = vrot.lane.b32.xlu1 %v1081_v13, %s2710_s30 }
 0x6bb   :  { %1098 = vrot.lane.b32.xlu1 %v3200_v47, %s2709_s13 }
 0x721   :  { %v1290_v11 = vpop.permute.xlu1 %1289 }
 0x722   :  { %v1292_v24 = vmul.f32 %v1290_v11, %v1287_v15 }
 0x724   :  { %v1294_v25 = vadd.f32 %v1293_v23, %v1292_v24 }
 0x725   :  { %v1083_v31 = vpop.permute.xlu1 %1082 }
 0x726   :  { %1296 = vrot.lane.b32.xlu0 %v1294_v25, %s2709_s13  ;;  %v1092_v33 = vsel %vm73_vm0, %v3195_v43, %v1083_v31  ;;  %v1093_v34 = vsel %vm73_vm0, %v3200_v47, %v1083_v31  ;;  %v3275_v5 = vrot.slane %v1294_v25, 2 }
 0x727   :  { %v1094_v37 = vsel %vm1071_vm12, %v1092_v33, %v1065_v51 }
 0x729   :  { %v1090_v35 = vpop.permute.xlu1 %1089 }
 0x72a   :  { %1086 = vrot.lane.b32.xlu0 %v3200_v47, %s2707_s29  ;;  %v1096_v38 = vsel %vm406_vm4, %v1094_v37, %v1090_v35 }
 0x72d   :  { %v3262_v59 = vpop.permute.xlu1 %1098 }
 0x798   :  { %v3234_v26 = vpop.permute.xlu0 %1296 }
 0x799   :  { %2505 = vmatmul.mubr.msk.f32.vlgmr.msra.gmra.mxu1 %vm1071_vm12, %v3234_v26 }
 0x79a   :  { %2519 = vmatpush3.msra.mxu1 %v3125_v16  ;;  %2526 = vmatprep.mubr.msk.f32.mxu1 %vm2702_vm1, %v2701_v1 }
 0x79b   :  { %2520 = vmatprep.subr.mxu1 %v2701_v1 }
 0x79c   :  { %2521 = vmatpush3.msra.mxu1 %v3132_v19  ;;  %v3251_v32 = vpop.permute.xlu0 %1086 }
 0x79d   :  { %2522 = vmatprep.subr.mxu1 %v2701_v1  ;;  %v1095_v36 = vsel %vm1071_vm12, %v1093_v34, %v3251_v32 }
 0x79e   :  { %2523 = vmatpush3.msra.mxu1 %v3139_v20  ;;  %v1097_v39 = vsel %vm406_vm4, %v1095_v36, %v1090_v35 }
 0x79f   :  { %2524 = vmatprep.subr.mxu1 %v2701_v1 }
 0x7a0   :  { %2525 = vmatpush3.msra.mxu1 %v3146_v22 }
 0x7a1   :  { %2540 = vmatprep.subr.mxu1 %v2701_v1 }
 0x859   :  { %v1366_v27 = vpop.f32.mrf.mxu1 }
 0x85a   :  { %v1367_v28 = vadd.f32 %v3193_v42, %v1366_v27 }
 0x85b   :  { %v2506_v29 = vpop.f32.mrf.mxu1 }
 0x85c   :  { %v1371_v30 = vrot.slane %v1367_v28, 2 }
 0x85e   :  { %1387 = vrot.lane.b32.xlu0 %v1371_v30, %s2708_s11  ;;  %v1373_v40 = vadd.f32 %v1371_v30, %v1096_v38  ;;  %v1374_v41 = vadd.f32 %v1371_v30, %v1097_v39 }
 0x860   :  { %v2221_v44 = vmul.f32 -1.442695, %v1373_v40  ;;  %v2222_v45 = vmul.f32 -1.442695, %v1374_v41 }
 0x862   :  { %1101 = vrot.lane.b32.xlu0 %v1081_v13, %s2708_s11  ;;  %2653 = vpow2.f32 %v2221_v44 }
 0x863   :  { %2655 = vpow2.f32 %v2222_v45 }
 0x86f   :  { %v2654_v46 = vpop.eup %2653 }
 0x870   :  { %v2656_v48 = vpop.eup %2655  ;;  %v1381_v49 = vadd.f32 1.0, %v2654_v46 }
 0x871   :  { %v1382_v52 = vadd.f32 1.0, %v2656_v48 }
 0x872   :  { %2657 = vrcp.f32 %v1381_v49 }
 0x873   :  { %2659 = vrcp.f32 %v1382_v52 }
 0x87f   :  { %v2658_v55 = vpop.eup %2657 }
 0x880   :  { %v2660_v57 = vpop.eup %2659  ;;  %v1396_v6 = vsub.f32 1.0, %v2658_v55  ;;  %v1410_v12 = vmul.f32 %v2658_v55, %v3275_v5 }
 0x881   :  { %v1397_v7 = vsub.f32 1.0, %v2660_v57  ;;  %v1411_v17 = vmul.f32 %v2660_v57, %v3275_v5 }
 0x8d0   :  { %v1388_v54 = vpop.permute.xlu0 %1387 }
 0x8d1   :  { %v1390_v60 = vmul.f32 %v2658_v55, %v1388_v54  ;;  %v1391_v61 = vmul.f32 %v2660_v57, %v1388_v54 }
 0x8d4   :  { %v1102_v62 = vpop.permute.xlu0 %1101 }
 0x8d5   :  { %v1104_v63 = vsel %vm73_vm0, %v3221_v10, %v1102_v62  ;;  %v1105_v0 = vsel %vm73_vm0, %v3262_v59, %v1102_v62 }
 0x8d6   :  { %v1392_v51 = vadd.f32 %v1390_v60, %v1104_v63  ;;  %v1393_v2 = vadd.f32 %v1391_v61, %v1105_v0 }
 0x8d8   :  { %2661 = vtanh.f32 %v1392_v51 }
 0x8d9   :  { %2663 = vtanh.f32 %v1393_v2 }
 0x8e5   :  { %v2662_v3 = vpop.eup %2661 }
 0x8e6   :  { %v2664_v53 = vpop.eup %2663  ;;  %1400 = vrot.lane.b32.xlu1 %v2662_v3, %s2711_s1 }
 0x8e7   :  { %1402 = vrot.lane.b32.xlu0 %v2664_v53, %s2711_s1  ;;  %v1133_v53 = vrot.slane %v3203_v50, 2 }
 0x8eb   :  { %1108 = vrot.lane.b32.xlu0 %v1107_v4, %s2709_s13 }
 0x8ef   :  { %1114 = vrot.lane.b32.xlu0 %v1107_v4, %s2710_s30 }
 0x8f3   :  { %1123 = vrot.lane.b32.xlu0 %v3203_v50, %s2709_s13 }
 0x958   :  { %v1401_v8 = vpop.permute.xlu1 %1400 }
 0x959   :  { %v1403_v10 = vpop.permute.xlu0 %1402  ;;  %v1406_v14 = vmul.f32 %v1401_v8, %v1396_v6 }
 0x95a   :  { %v1407_v18 = vmul.f32 %v1403_v10, %v1397_v7 }
 0x95b   :  { %v3279_v21 = vadd.f32 %v1410_v12, %v1406_v14 }
 0x95c   :  { %v3281_v9 = vadd.f32 %v1411_v17, %v1407_v18 }
 0x95d   :  { %v1416_v13 = vrot.slane %v3279_v21, 6  ;;  %v1109_v29 = vpop.permute.xlu0 %1108  ;;  %v1531_v6 = vrot.slane %v3279_v21, 2 }
 0x95e   :  { %v1417_v15 = vrot.slane %v3281_v9, 6  ;;  %v1117_v31 = vsel %vm73_vm0, %v3200_v47, %v1109_v29  ;;  %v1118_v33 = vsel %vm73_vm0, %v3203_v50, %v1109_v29  ;;  %v1532_v7 = vrot.slane %v3281_v9, 2 }
 0x95f   :  { %v1119_v36 = vsel %vm1071_vm12, %v1117_v31, %v3251_v32 }
 0x960   :  { %v1418_v11 = vsel %vm1056_vm11, %v1416_v13, %v1417_v15  ;;  %v1533_v12 = vsel %vm1131_vm13, %v1531_v6, %v1532_v7 }
 0x961   :  { %1419 = vrot.lane.b32.xlu1 %v1418_v11, %s2709_s13  ;;  %v1115_v34 = vpop.permute.xlu0 %1114 }
 0x962   :  { %v1121_v37 = vsel %vm406_vm4, %v1119_v36, %v1115_v34 }
 0x965   :  { %1111 = vrot.lane.b32.xlu1 %v3203_v50, %s2707_s29  ;;  %v3318_v32 = vpop.permute.xlu0 %1123 }
 0x9d3   :  { %v3289_v23 = vpop.permute.xlu1 %1419 }
 0x9d4   :  { %2516 = vmatmul.mubr.msk.f32.vlgmr.msra.gmra.mxu0 %vm1071_vm12, %v3289_v23 }
 0x9d5   :  { %2530 = vmatpush3.msra.mxu0 %v3125_v16  ;;  %2537 = vmatprep.mubr.msk.f32.mxu0 %vm2702_vm1, %v2701_v1 }
 0x9d6   :  { %2531 = vmatprep.subr.mxu0 %v2701_v1 }
 0x9d7   :  { %2532 = vmatpush3.msra.mxu0 %v3132_v19  ;;  %v3306_v30 = vpop.permute.xlu1 %1111 }
 0x9d8   :  { %2533 = vmatprep.subr.mxu0 %v2701_v1  ;;  %v1120_v35 = vsel %vm1071_vm12, %v1118_v33, %v3306_v30 }
 0x9d9   :  { %2534 = vmatpush3.msra.mxu0 %v3139_v20  ;;  %v1122_v38 = vsel %vm406_vm4, %v1120_v35, %v1115_v34 }
 0x9da   :  { %2535 = vmatprep.subr.mxu0 %v2701_v1 }
 0x9db   :  { %2536 = vmatpush3.msra.mxu0 %v3146_v22 }
 0x9dc   :  { %2551 = vmatprep.subr.mxu0 %v2701_v1 }
 0xa94   :  { %v1489_v24 = vpop.f32.mrf.mxu0 }
 0xa95   :  { %v1490_v25 = vadd.f32 %v3193_v42, %v1489_v24 }
 0xa96   :  { %v2517_v27 = vpop.f32.mrf.mxu0 }
 0xa97   :  { %v1494_v28 = vrot.slane %v1490_v25, 4 }
 0xa99   :  { %1510 = vrot.lane.b32.xlu1 %v1494_v28, %s2708_s11  ;;  %v1496_v39 = vadd.f32 %v1494_v28, %v1121_v37  ;;  %v1497_v40 = vadd.f32 %v1494_v28, %v1122_v38 }
 0xa9b   :  { %v2224_v41 = vmul.f32 -1.442695, %v1496_v39  ;;  %v2225_v44 = vmul.f32 -1.442695, %v1497_v40 }
 0xa9d   :  { %1126 = vrot.lane.b32.xlu1 %v1107_v4, %s2708_s11  ;;  %2665 = vpow2.f32 %v2224_v41  ;;  %v1132_v4 = vrot.slane %v3200_v47, 2 }
 0xa9e   :  { %2667 = vpow2.f32 %v2225_v44 }
 0xaaa   :  { %v2666_v45 = vpop.eup %2665 }
 0xaab   :  { %v2668_v46 = vpop.eup %2667  ;;  %v1504_v48 = vadd.f32 1.0, %v2666_v45 }
 0xaac   :  { %v1505_v49 = vadd.f32 1.0, %v2668_v46 }
 0xaad   :  { %2669 = vrcp.f32 %v1504_v48 }
 0xaae   :  { %2671 = vrcp.f32 %v1505_v49 }
 0xaba   :  { %v2670_v54 = vpop.eup %2669 }
 0xabb   :  { %v2672_v55 = vpop.eup %2671  ;;  %v1519_v8 = vsub.f32 1.0, %v2670_v54  ;;  %v1536_v18 = vmul.f32 %v2670_v54, %v1533_v12 }
 0xabc   :  { %v1520_v10 = vsub.f32 1.0, %v2672_v55  ;;  %v1537_v15 = vmul.f32 %v2672_v55, %v1532_v7 }
 0xb0b   :  { %v1511_v52 = vpop.permute.xlu1 %1510 }
 0xb0c   :  { %v1513_v57 = vmul.f32 %v2670_v54, %v1511_v52  ;;  %v1514_v60 = vmul.f32 %v2672_v55, %v1511_v52  ;;  %v1148_v54 = vrot.slane %v3195_v43, 6 }
 0xb0f   :  { %v1127_v61 = vpop.permute.xlu1 %1126 }
 0xb10   :  { %v1129_v62 = vsel %vm73_vm0, %v3262_v59, %v1127_v61  ;;  %v1130_v63 = vsel %vm73_vm0, %v3318_v32, %v1127_v61  ;;  %v1134_v59 = vsel %vm1131_vm13, %v1132_v4, %v1133_v53 }
 0xb11   :  { %v1515_v0 = vadd.f32 %v1513_v57, %v1129_v62  ;;  %v1516_v51 = vadd.f32 %v1514_v60, %v1130_v63 }
 0xb13   :  { %2673 = vtanh.f32 %v1515_v0 }
 0xb14   :  { %2675 = vtanh.f32 %v1516_v51 }
 0xb20   :  { %v2674_v2 = vpop.eup %2673 }
 0xb21   :  { %v2676_v3 = vpop.eup %2675  ;;  %1523 = vrot.lane.b32.xlu0 %v2674_v2, %s2711_s1 }
 0xb22   :  { %1525 = vrot.lane.b32.xlu1 %v2676_v3, %s2711_s1 }
 0xb26   :  { %1135 = vrot.lane.b32.xlu1 %v1134_v59, %s2709_s13 }
 0xb93   :  { %v1524_v14 = vpop.permute.xlu0 %1523 }
 0xb94   :  { %v1526_v17 = vpop.permute.xlu1 %1525  ;;  %v1529_v13 = vmul.f32 %v1524_v14, %v1519_v8 }
 0xb95   :  { %v1530_v11 = vmul.f32 %v1526_v17, %v1520_v10 }
 0xb96   :  { %v3333_v24 = vadd.f32 %v1536_v18, %v1529_v13 }
 0xb97   :  { %v3335_v25 = vadd.f32 %v1537_v15, %v1530_v11 }
 0xb98   :  { %v1543_v27 = vrot.slane %v3333_v24, 4  ;;  %v1136_v36 = vpop.permute.xlu1 %1135  ;;  %v1642_v57 = vrot.slane %v3333_v24, 2 }
 0xb99   :  { %v1544_v28 = vrot.slane %v3335_v25, 4 }
 0xb9b   :  { %v1545_v29 = vsel %vm1542_vm14, %v1543_v27, %v1544_v28 }
 0xb9c   :  { %1546 = vrot.lane.b32.xlu0 %v1545_v29, %s2709_s13 }
 0xba0   :  { %1138 = vrot.lane.b32.xlu0 %v1134_v59, %s2710_s30 }
 0xba4   :  { %1144 = vrot.lane.b32.xlu0 %v1134_v59, %s2708_s11 }
 0xc0e   :  { %v1547_v31 = vpop.permute.xlu0 %1546 }
 0xc0f   :  { %2527 = vmatmul.mubr.msk.f32.vlgmr.msra.gmra.mxu1 %vm1071_vm12, %v1547_v31 }
 0xc10   :  { %2541 = vmatpush3.msra.mxu1 %v3125_v16  ;;  %2548 = vmatprep.mubr.msk.f32.mxu1 %vm2702_vm1, %v2701_v1 }
 0xc11   :  { %2542 = vmatprep.subr.mxu1 %v2701_v1 }
 0xc12   :  { %2543 = vmatpush3.msra.mxu1 %v3132_v19  ;;  %v1141_v19 = vsel %vm73_vm0, %v3203_v50, %v1136_v36  ;;  %v1139_v37 = vpop.permute.xlu0 %1138 }
 0xc13   :  { %2544 = vmatprep.subr.mxu1 %v2701_v1 }
 0xc14   :  { %2545 = vmatpush3.msra.mxu1 %v3139_v20  ;;  %v1142_v20 = vsel %vm1071_vm12, %v1141_v19, %v3306_v30  ;;  %v1149_v30 = vrot.slane %v3200_v47, 6 }
 0xc15   :  { %2546 = vmatprep.subr.mxu1 %v2701_v1  ;;  %v1143_v38 = vsel %vm406_vm4, %v1142_v20, %v1139_v37 }
 0xc16   :  { %2547 = vmatpush3.msra.mxu1 %v3146_v22  ;;  %v1145_v44 = vpop.permute.xlu0 %1144  ;;  %v1150_v55 = vsel %vm1056_vm11, %v1148_v54, %v1149_v30 }
 0xc17   :  { %2574 = vmatprep.subr.mxu1 %v2701_v1  ;;  %v1147_v49 = vsel %vm73_vm0, %v3318_v32, %v1145_v44  ;;  %v1643_v32 = vrot.slane %v3335_v25, 2 }
 0xc19   :  { %v3374_v47 = vsel %vm1131_vm13, %v1642_v57, %v1643_v32 }
 0xccf   :  { %v1616_v33 = vpop.f32.mrf.mxu1 }
 0xcd0   :  { %v1617_v16 = vadd.f32 %v3193_v42, %v1616_v33 }
 0xcd1   :  { %v2528_v34 = vpop.f32.mrf.mxu1 }
 0xcd2   :  { %v1621_v35 = vrot.slane %v1617_v16, 6  ;;  %v1170_v34 = vrot.slane %v3195_v43, 2 }
 0xcd4   :  { %1630 = vrot.lane.b32.xlu1 %v1621_v35, %s2708_s11  ;;  %v1623_v22 = vadd.f32 %v1621_v35, %v1143_v38 }
 0xcd6   :  { %v2227_v39 = vmul.f32 -1.442695, %v1623_v22 }
 0xcd8   :  { %2677 = vpow2.f32 %v2227_v39 }
 0xce5   :  { %v2678_v40 = vpop.eup %2677 }
 0xce6   :  { %v1627_v41 = vadd.f32 1.0, %v2678_v40 }
 0xce8   :  { %2679 = vrcp.f32 %v1627_v41 }
 0xcf5   :  { %v2680_v45 = vpop.eup %2679 }
 0xcf6   :  { %v1636_v60 = vsub.f32 1.0, %v2680_v45  ;;  %v1646_v62 = vmul.f32 %v2680_v45, %v3374_v47 }
 0xd46   :  { %v1631_v46 = vpop.permute.xlu1 %1630 }
 0xd47   :  { %v1633_v48 = vmul.f32 %v2680_v45, %v1631_v46 }
 0xd49   :  { %v1634_v50 = vadd.f32 %v1633_v48, %v1147_v49 }
 0xd4b   :  { %2681 = vtanh.f32 %v1634_v50 }
 0xd58   :  { %v2682_v52 = vpop.eup %2681 }
 0xd59   :  { %1638 = vrot.lane.b32.xlu1 %v2682_v52, %s2711_s1 }
 0xd5d   :  { %1151 = vrot.lane.b32.xlu1 %v1150_v55, %s2709_s13 }
 0xd61   :  { %1157 = vrot.lane.b32.xlu1 %v1150_v55, %s2710_s30 }
 0xd65   :  { %1163 = vrot.lane.b32.xlu1 %v3205_v56, %s2709_s13 }
 0xdcb   :  { %v1639_v61 = vpop.permute.xlu1 %1638 }
 0xdcc   :  { %v1641_v63 = vmul.f32 %v1639_v61, %v1636_v60 }
 0xdce   :  { %v3377_v0 = vadd.f32 %v1646_v62, %v1641_v63 }
 0xdcf   :  { %v1152_v59 = vpop.permute.xlu1 %1151 }
 0xdd0   :  { %v1649_v51 = vrot.slane %v3377_v0, 2  ;;  %v1160_v7 = vsel %vm73_vm0, %v3205_v56, %v1152_v59 }
 0xdd2   :  { %1650 = vrot.lane.b32.xlu0 %v1649_v51, %s2709_s13 }
 0xdd3   :  { %v1158_v10 = vpop.permute.xlu1 %1157 }
 0xdd6   :  { %1154 = vrot.lane.b32.xlu0 %v3205_v56, %s2707_s29 }
 0xdd7   :  { %v1164_v27 = vpop.permute.xlu1 %1163 }
 0xe44   :  { %v1651_v2 = vpop.permute.xlu0 %1650 }
 0xe45   :  { %2538 = vmatmul.mubr.msk.f32.vlgmr.msra.gmra.mxu0 %vm1071_vm12, %v1651_v2 }
 0xe46   :  { %2559 = vmatprep.mubr.msk.f32.mxu0 %vm2702_vm1, %v2701_v1 }
 0xe48   :  { %v1155_v6 = vpop.permute.xlu0 %1154 }
 0xe49   :  { %v1161_v8 = vsel %vm1071_vm12, %v1160_v7, %v1155_v6 }
 0xe4a   :  { %v1162_v12 = vsel %vm406_vm4, %v1161_v8, %v1158_v10 }
 0xf05   :  { %v1720_v3 = vpop.f32.mrf.mxu0 }
 0xf06   :  { %v1721_v53 = vadd.f32 %v3193_v42, %v1720_v3 }
 0xf07   :  { %v2539_v4 = vpop.f32.mrf.mxu0 }
 0xf08   :  { %1732 = vrot.lane.b32.xlu0 %v1721_v53, %s2708_s11  ;;  %v1724_v14 = vadd.f32 %v1721_v53, %v1162_v12 }
 0xf0a   :  { %v2229_v17 = vmul.f32 -1.442695, %v1724_v14  ;;  %v1927_v14 = vld [vmem:[%s3569_s14 + $0x18] sm:$0xff] }
 0xf0b   :  { %2552 = vmatpush3.msra.mxu0 %v1927_v14 }
 0xf0c   :  { %1166 = vrot.lane.b32.xlu0 %v1150_v55, %s2708_s11  ;;  %2683 = vpow2.f32 %v2229_v17  ;;  %2553 = vmatprep.subr.mxu0 %v2701_v1  ;;  %v1893_v17 = vrot.slane %v3377_v0, 6 }
 0xf19   :  { %v2684_v18 = vpop.eup %2683 }
 0xf1a   :  { %v1728_v13 = vadd.f32 1.0, %v2684_v18 }
 0xf1c   :  { %2685 = vrcp.f32 %v1728_v13 }
 0xf29   :  { %v2686_v11 = vpop.eup %2685 }
 0xf2a   :  { %v1738_v35 = vsub.f32 1.0, %v2686_v11  ;;  %v1745_v19 = vmul.f32 %v2686_v11, %v1649_v51 }
 0xf7a   :  { %v1733_v15 = vpop.permute.xlu0 %1732 }
 0xf7b   :  { %v1735_v28 = vmul.f32 %v2686_v11, %v1733_v15 }
 0xf7e   :  { %v1167_v29 = vpop.permute.xlu0 %1166 }
 0xf7f   :  { %v1169_v31 = vsel %vm73_vm0, %v1164_v27, %v1167_v29 }
 0xf80   :  { %v1736_v33 = vadd.f32 %v1735_v28, %v1169_v31 }
 0xf82   :  { %2687 = vtanh.f32 %v1736_v33 }
 0xf8f   :  { %v2688_v16 = vpop.eup %2687 }
 0xf90   :  { %1740 = vrot.lane.b32.xlu1 %v2688_v16, %s2711_s1 }
 0xf94   :  { %1171 = vrot.lane.b32.xlu1 %v1170_v34, %s2709_s13 }
 0xf98   :  { %1177 = vrot.lane.b32.xlu1 %v1170_v34, %s2710_s30 }
 0xf9c   :  { %1186 = vrot.lane.b32.xlu1 %v3207_v58, %s2709_s13 }
0x1002   :  { %v1741_v36 = vpop.permute.xlu1 %1740 }
0x1003   :  { %v1743_v37 = vmul.f32 %v1741_v36, %v1738_v35  ;;  %v2051_v36 = vld [vmem:[%s3570_s16 + $0x30] sm:$0x3] }
0x1005   :  { %v1746_v20 = vadd.f32 %v1745_v19, %v1743_v37  ;;  %v2050_v19 = vld [vmem:[%s3570_s16 + $0x28] sm:$0xff]  ;;  %v2049_v37 = vld [vmem:[%s3570_s16 + $0x20] sm:$0xff] }
0x1006   :  { %v1172_v41 = vpop.permute.xlu1 %1171 }
0x1007   :  { %1748 = vrot.lane.b32.xlu0 %v1746_v20, %s2709_s13  ;;  %v1180_v45 = vsel %vm73_vm0, %v3205_v56, %v1172_v41  ;;  %v1181_v46 = vsel %vm73_vm0, %v3207_v58, %v1172_v41  ;;  %v1860_v12 = vrot.slane %v1746_v20, 2 }
0x1008   :  { %v1182_v50 = vsel %vm1071_vm12, %v1180_v45, %v1155_v6 }
0x100a   :  { %v1178_v48 = vpop.permute.xlu1 %1177 }
0x100b   :  { %1174 = vrot.lane.b32.xlu0 %v3207_v58, %s2707_s29 }
0x100e   :  { %v1187_v51 = vpop.permute.xlu1 %1186 }
0x1079   :  { %v3403_v38 = vpop.permute.xlu0 %1748 }
0x107a   :  { %2549 = vmatmul.mubr.msk.f32.vlgmr.msra.gmra.mxu1 %vm1071_vm12, %v3403_v38 }
0x107b   :  { %2588 = vmatprep.mubr.msk.f32.mxu1 %vm2702_vm1, %v2701_v1  ;;  %2575 = vmatpush3.msk.msra.mxu1 %vm1056_vm11, %v2051_v36 }
0x107c   :  { %2576 = vmatprep.subr.mxu1 %v2701_v1 }
0x107d   :  { %v1175_v44 = vpop.permute.xlu0 %1174  ;;  %2577 = vmatpush3.msra.mxu1 %v2050_v19 }
0x107e   :  { %v1183_v49 = vsel %vm1071_vm12, %v1181_v46, %v1175_v44  ;;  %2578 = vmatprep.subr.mxu1 %v2701_v1 }
0x107f   :  { %v1185_v52 = vsel %vm406_vm4, %v1183_v49, %v1178_v48  ;;  %2579 = vmatpush3.msra.mxu1 %v2049_v37 }
0x1080   :  { %2580 = vmatprep.subr.mxu1 %v2701_v1 }
0x113a   :  { %v1818_v43 = vpop.f32.mrf.mxu1 }
0x113b   :  { %v1819_v22 = vadd.f32 %v3193_v42, %v1818_v43  ;;  %v1184_v42 = vsel %vm406_vm4, %v1182_v50, %v1178_v48 }
0x113c   :  { %v2550_v39 = vpop.f32.mrf.mxu1 }
0x113d   :  { %v1823_v40 = vrot.slane %v1819_v22, 2 }
0x113f   :  { %1839 = vrot.lane.b32.xlu0 %v1823_v40, %s2708_s11  ;;  %v1825_v30 = vadd.f32 %v1823_v40, %v1184_v42  ;;  %v1826_v54 = vadd.f32 %v1823_v40, %v1185_v52 }
0x1141   :  { %v2231_v55 = vmul.f32 -1.442695, %v1825_v30  ;;  %v2232_v32 = vmul.f32 -1.442695, %v1826_v54 }
0x1143   :  { %1189 = vrot.lane.b32.xlu0 %v1170_v34, %s2708_s11  ;;  %2689 = vpow2.f32 %v2231_v55 }
0x1144   :  { %2691 = vpow2.f32 %v2232_v32  ;;  %v1908_v32 = vsel %vm73_vm0, %v3403_v38, %v3289_v23  ;;  %v2046_v23 = vld [vmem:[%s3570_s16 + $0x8] sm:$0xff]  ;;  %v2045_v38 = vld [vmem:[%s3570_s16] sm:$0xff] }
0x1150   :  { %v2690_v57 = vpop.eup %2689 }
0x1151   :  { %v2692_v56 = vpop.eup %2691  ;;  %v1833_v60 = vadd.f32 1.0, %v2690_v57 }
0x1152   :  { %v1834_v61 = vadd.f32 1.0, %v2692_v56 }
0x1153   :  { %2693 = vrcp.f32 %v1833_v60 }
0x1154   :  { %2695 = vrcp.f32 %v1834_v61 }
0x1160   :  { %v2694_v62 = vpop.eup %2693 }
0x1161   :  { %v2696_v63 = vpop.eup %2695  ;;  %v1862_v11 = vmul.f32 %v2694_v62, %v1860_v12 }
0x1162   :  { %v1849_v18 = vsub.f32 1.0, %v2696_v63  ;;  %v1863_v28 = vmul.f32 %v2696_v63, %v1860_v12 }
0x11b1   :  { %v1840_v58 = vpop.permute.xlu0 %1839 }
0x11b2   :  { %v1842_v2 = vmul.f32 %v2694_v62, %v1840_v58  ;;  %v1843_v3 = vmul.f32 %v2696_v63, %v1840_v58  ;;  %v2047_v58 = vld [vmem:[%s3570_s16 + $0x10] sm:$0xff] }
0x11b5   :  { %v1190_v53 = vpop.permute.xlu0 %1189 }
0x11b6   :  { %v1192_v4 = vsel %vm73_vm0, %v1164_v27, %v1190_v53  ;;  %v1193_v59 = vsel %vm73_vm0, %v1187_v51, %v1190_v53 }
0x11b7   :  { %v1844_v6 = vadd.f32 %v1842_v2, %v1192_v4  ;;  %v1845_v7 = vadd.f32 %v1843_v3, %v1193_v59 }
0x11b9   :  { %2697 = vtanh.f32 %v1844_v6 }
0x11ba   :  { %2699 = vtanh.f32 %v1845_v7 }
0x11c6   :  { %v2698_v8 = vpop.eup %2697 }
0x11c7   :  { %v2700_v10 = vpop.eup %2699  ;;  %1852 = vrot.lane.b32.xlu1 %v2698_v8, %s2711_s1 }
0x11c8   :  { %1854 = vrot.lane.b32.xlu0 %v2700_v10, %s2711_s1 }
0x11cb   :  { %1882 = vrot.lane.b32.xlu1 %v1860_v12, %s2709_s13 }
0x11cc   :  { %1876 = vrot.lane.b32.xlu0 %v3279_v21, %s2709_s13  ;;  %v1926_v21 = vld [vmem:[%s3569_s14 + $0x10] sm:$0xff] }
0x11cd   :  { %2554 = vmatpush3.msra.mxu0 %v1926_v21 }
0x11ce   :  { %2555 = vmatprep.subr.mxu0 %v2701_v1 }
0x11cf   :  { %1887 = vrot.lane.b32.xlu1 %v3333_v24, %s2709_s13  ;;  %v1925_v24 = vld [vmem:[%s3569_s14 + $0x8] sm:$0xff] }
0x11d0   :  { %1878 = vrot.lane.b32.xlu0 %v3281_v9, %s2709_s13  ;;  %2556 = vmatpush3.msra.mxu0 %v1925_v24  ;;  %v1924_v9 = vld [vmem:[%s3569_s14] sm:$0xff] }
0x11d1   :  { %2557 = vmatprep.subr.mxu0 %v2701_v1 }
0x11d2   :  { %2558 = vmatpush3.msra.mxu0 %v1924_v9 }
0x11d4   :  { %1894 = vrot.lane.b32.xlu0 %v1893_v17, %s2709_s13 }
0x11d8   :  { %1899 = vrot.lane.b32.xlu0 %v3377_v0, %s2709_s13  ;;  %v1848_v0 = vsub.f32 1.0, %v2694_v62  ;;  %v2233_v62 = vld [vmem:[%s3571_s15] ss:$0 sm:$0xff] }
0x1239   :  { %v1853_v13 = vpop.permute.xlu1 %1852 }
0x123a   :  { %v1855_v15 = vpop.permute.xlu0 %1854  ;;  %v1858_v27 = vmul.f32 %v1853_v13, %v1848_v0 }
0x123b   :  { %v1859_v29 = vmul.f32 %v1855_v15, %v1849_v18  ;;  %v2239_v15 = vld [vmem:[%s3572_s17] ss:$0 sm:$0xff] }
0x123c   :  { %v1864_v31 = vadd.f32 %v1862_v11, %v1858_v27 }
0x123d   :  { %v1865_v33 = vadd.f32 %v1863_v28, %v1859_v29  ;;  %v1883_v20 = vpop.permute.xlu1 %1882 }
0x123e   :  { %v1869_v16 = vrot.slane %v1864_v31, 6  ;;  %1909 = vrot.lane.b32.xlu0 %v1864_v31, %s2709_s13 }
0x123f   :  { %v1870_v34 = vrot.slane %v1865_v33, 6 }
0x1241   :  { %v1871_v35 = vsel %vm1056_vm11, %v1869_v16, %v1870_v34  ;;  %v1888_v22 = vpop.permute.xlu1 %1887 }
0x1242   :  { %1872 = vrot.lane.b32.xlu1 %v1871_v35, %s2709_s13  ;;  %1911 = vrot.lane.b32.xlu0 %v1865_v33, %s2709_s13 }
0x1246   :  { %1889 = vrot.lane.b32.xlu1 %v3335_v25, %s2709_s13  ;;  %v2048_v25 = vld [vmem:[%s3570_s16 + $0x18] sm:$0xff] }
0x1247   :  { %2581 = vmatpush3.msra.mxu1 %v2048_v25 }
0x1248   :  { %2582 = vmatprep.subr.mxu1 %v2701_v1 }
0x1249   :  { %2583 = vmatpush3.msra.mxu1 %v2047_v58 }
0x124a   :  { %1902 = vrot.lane.b32.xlu1 %v3374_v47, %s2709_s13  ;;  %v1877_v47 = vpop.permute.xlu0 %1876  ;;  %2584 = vmatprep.subr.mxu1 %v2701_v1 }
0x124b   :  { %v1885_v41 = vsel %vm73_vm0, %v1877_v47, %v1883_v20  ;;  %2585 = vmatpush3.msra.mxu1 %v2046_v23 }
0x124c   :  { %2586 = vmatprep.subr.mxu1 %v2701_v1 }
0x124d   :  { %2587 = vmatpush3.msra.mxu1 %v2045_v38 }
0x124e   :  { %1915 = vrot.lane.b32.xlu1 %v3275_v5, %s2709_s13  ;;  %v1879_v43 = vpop.permute.xlu0 %1878 }
0x124f   :  { %v1886_v48 = vsel %vm73_vm0, %v1879_v43, %v1883_v20 }
0x1252   :  { %v1895_v39 = vpop.permute.xlu0 %1894 }
0x1253   :  { %v1897_v5 = vsel %vm73_vm0, %v1888_v22, %v1895_v39 }
0x1254   :  { %v1921_v49 = vsel %vm1542_vm14, %v1886_v48, %v1897_v5 }
0x1256   :  { %v1900_v50 = vpop.permute.xlu0 %1899 }
0x12b0   :  { %v1910_v54 = vpop.permute.xlu0 %1909 }
0x12b4   :  { %v1873_v40 = vpop.permute.xlu1 %1872  ;;  %v1912_v60 = vpop.permute.xlu0 %1911 }
0x12b5   :  { %v1875_v44 = vsel %vm73_vm0, %v3234_v26, %v1873_v40 }
0x12b6   :  { %v1920_v45 = vsel %vm1131_vm13, %v1875_v44, %v1885_v41 }
0x12b7   :  { %2560 = vmatmul.mubr.msk.f32.vlgmr.msra.gmra.mxu0 %vm1071_vm12, %v1920_v45 }
0x12b8   :  { %v1890_v46 = vpop.permute.xlu1 %1889  ;;  %2562 = vmatprep.mubr.msk.f32.mxu0 %vm2702_vm1, %v2701_v1 }
0x12b9   :  { %v1898_v26 = vsel %vm73_vm0, %v1890_v46, %v1895_v39 }
0x12bb   :  { %2563 = vmatmul.mubr.msk.f32.gmra.mxu0 %vm1071_vm12, %v1921_v49 }
0x12bc   :  { %v1903_v42 = vpop.permute.xlu1 %1902  ;;  %2565 = vmatprep.mubr.msk.f32.mxu0 %vm2702_vm1, %v2701_v1 }
0x12bd   :  { %v1905_v52 = vsel %vm73_vm0, %v1900_v50, %v1903_v42 }
0x12be   :  { %v1922_v30 = vsel %vm1056_vm11, %v1898_v26, %v1905_v52 }
0x12bf   :  { %2566 = vmatmul.mubr.msk.f32.gmra.mxu0 %vm1071_vm12, %v1922_v30 }
0x12c0   :  { %v1916_v55 = vpop.permute.xlu1 %1915  ;;  %2568 = vmatprep.mubr.msk.f32.mxu0 %vm2702_vm1, %v2701_v1 }
0x12c1   :  { %v1918_v57 = vsel %vm73_vm0, %v1910_v54, %v1916_v55  ;;  %v1919_v61 = vsel %vm73_vm0, %v1912_v60, %v1916_v55  ;;  %vm2172_vm0 = vcmask 27648  }
0x12c2   :  { %v1923_v56 = vsel %vm1131_vm13, %v1908_v32, %v1918_v57 }
0x12c3   :  { %2569 = vmatmul.mubr.msk.f32.gmra.mxu0 %vm1071_vm12, %v1923_v56 }
0x12c4   :  { %2571 = vmatprep.mubr.msk.f32.mxu0 %vm2702_vm1, %v2701_v1 }
0x12c7   :  { %2572 = vmatmul.mubr.msk.f32.gmra.mxu0 %vm1071_vm12, %v1919_v61 }
0x1377   :  { %v2016_v63 = vpop.f32.mrf.mxu0 }
0x1378   :  { %v2017_v51 = vadd.f32 %v2233_v62, %v2016_v63 }
0x1379   :  { %v2561_v2 = vpop.f32.mrf.mxu0 }
0x137a   :  { %v2040_v3 = vmax.f32 %v2017_v51, 0.0 }
0x137b   :  { %v2021_v53 = vpop.f32.mrf.mxu0 }
0x137c   :  { %v2022_v4 = vadd.f32 %v2233_v62, %v2021_v53  ;;  %2589 = vmatmul.mubr.msk.f32.vlgmr.msra.gmra.mxu1 %vm2059_vm15, %v2040_v3 }
0x137d   :  { %v2564_v59 = vpop.f32.mrf.mxu0  ;;  %2591 = vmatprep.mubr.msk.f32.mxu1 %vm2702_vm1, %v2701_v1 }
0x137e   :  { %v2041_v6 = vmax.f32 %v2022_v4, 0.0 }
0x137f   :  { %v2026_v7 = vpop.f32.mrf.mxu0 }
0x1380   :  { %v2027_v8 = vadd.f32 %v2233_v62, %v2026_v7  ;;  %2592 = vmatmul.mubr.msk.f32.gmra.mxu1 %vm2059_vm15, %v2041_v6 }
0x1381   :  { %v2567_v10 = vpop.f32.mrf.mxu0  ;;  %2594 = vmatprep.mubr.msk.f32.mxu1 %vm2702_vm1, %v2701_v1 }
0x1382   :  { %v2042_v12 = vmax.f32 %v2027_v8, 0.0 }
0x1383   :  { %v2031_v14 = vpop.f32.mrf.mxu0 }
0x1384   :  { %v2032_v17 = vadd.f32 %v2233_v62, %v2031_v14  ;;  %2595 = vmatmul.mubr.msk.f32.gmra.mxu1 %vm2059_vm15, %v2042_v12 }
0x1385   :  { %v2570_v21 = vpop.f32.mrf.mxu0  ;;  %2597 = vmatprep.mubr.msk.f32.mxu1 %vm2702_vm1, %v2701_v1 }
0x1386   :  { %v2043_v24 = vmax.f32 %v2032_v17, 0.0 }
0x1387   :  { %v2036_v9 = vpop.f32.mrf.mxu0 }
0x1388   :  { %v2037_v0 = vadd.f32 %v2233_v62, %v2036_v9  ;;  %2598 = vmatmul.mubr.msk.f32.gmra.mxu1 %vm2059_vm15, %v2043_v24 }
0x1389   :  { %v2573_v18 = vpop.f32.mrf.mxu0  ;;  %2600 = vmatprep.mubr.msk.f32.mxu1 %vm2702_vm1, %v2701_v1 }
0x138a   :  { %v2044_v13 = vmax.f32 %v2037_v0, 0.0 }
0x138c   :  { %2601 = vmatmul.mubr.msk.f32.gmra.mxu1 %vm2059_vm15, %v2044_v13 }
0x143c   :  { %v2144_v11 = vpop.f32.mrf.mxu1 }
0x143d   :  { %v2145_v27 = vadd.f32 %v2239_v15, %v2144_v11 }
0x143e   :  { %v2590_v28 = vpop.f32.mrf.mxu1 }
0x143f   :  { %2168 = vst.msk [vmem:[%s3573_s18] sm:$0xff] %vm468_vm2, %v2145_v27 }
0x1440   :  { %v2149_v29 = vpop.f32.mrf.mxu1 }
0x1441   :  { %v2150_v31 = vadd.f32 %v2239_v15, %v2149_v29 }
0x1442   :  { %v2593_v33 = vpop.f32.mrf.mxu1 }
0x1443   :  { %2169 = vst.msk [vmem:[%s3573_s18 + $0x8] sm:$0xff] %vm468_vm2, %v2150_v31 }
0x1444   :  { %v2154_v1 = vpop.f32.mrf.mxu1 }
0x1445   :  { %v2155_v16 = vadd.f32 %v2239_v15, %v2154_v1 }
0x1446   :  { %v2596_v34 = vpop.f32.mrf.mxu1 }
0x1447   :  { %2170 = vst.msk [vmem:[%s3573_s18 + $0x10] sm:$0xff] %vm468_vm2, %v2155_v16 }
0x1448   :  { %v2159_v35 = vpop.f32.mrf.mxu1 }
0x1449   :  { %v2160_v36 = vadd.f32 %v2239_v15, %v2159_v35 }
0x144a   :  { %v2599_v19 = vpop.f32.mrf.mxu1 }
0x144b   :  { %2171 = vst.msk [vmem:[%s3573_s18 + $0x18] sm:$0xff] %vm468_vm2, %v2160_v36 }
0x144c   :  { %v2164_v37 = vpop.f32.mrf.mxu1 }
0x144d   :  { %v2165_v25 = vadd.f32 %v2239_v15, %v2164_v37 }
0x144e   :  { %v2602_v47 = vpop.f32.mrf.mxu1 }
0x144f   :  { %2173 = vst.msk [vmem:[%s3573_s18 + $0x20] sm:$0xf] %vm2172_vm0, %v2165_v25 }

</bundles_post_ra>
